<compile_context>
chip_gen: v7x
topology: tpu7x:2x2x1
jax: 0.10.0
libtpu: 0.0.40
codegen_flags: <defaults>
</compile_context>

<pallas_src>
import jax
import jax.numpy as jnp
from jax import lax
from jax.experimental import pallas as pl
from jax.experimental.pallas import tpu as pltpu

DROPOUT = 0.2                      # identity in eval mode
BLOCK_SIZE = 256                   # max sequence length supported by causal mask
N_EMBED = 384
NUM_HEADS = 6
HEAD_SIZE = N_EMBED // NUM_HEADS   # 64

# bf16 operands for the MXU on all generations; f32 accumulation throughout.
COMPUTE_DTYPE = jnp.bfloat16


def mha_kernel(x_ref, wqkv_ref, wp_ref, bp_ref, o_ref, qkv_ref, cat_ref):
    """One grid step == one block of BB batch elements.

    x_ref    : (BB, T, C)    VMEM  bf16
    wqkv_ref : (C, 3*C)      VMEM  bf16  columns = [Q heads | K heads | V heads]
                                         (softmax scale pre-folded into Q cols)
    wp_ref   : (C, C)        VMEM  bf16  output projection, input-major
    bp_ref   : (1, C)        VMEM  f32   output projection bias
    o_ref    : (BB, T, C)    VMEM  f32
    qkv_ref  : (BB*T, 3*C)   VMEM  bf16 scratch (fused QKV projection output)
    cat_ref  : (BB*T, C)     VMEM  bf16 scratch (per-head attention outputs,
                                         laid out head-major == torch.cat)
    """
    BB, T, C = x_ref.shape
    rows = BB * T

    # ---- fused, lane-dense QKV projection: one (rows, C) @ (C, 3C) matmul ----
    x2d = x_ref[...].reshape(rows, C)
    qkv_ref[...] = jnp.dot(
        x2d, wqkv_ref[...], preferred_element_type=jnp.float32
    ).astype(qkv_ref.dtype)

    # causal mask as an additive bias, hoisted out of the head loop
    row_id = lax.broadcasted_iota(jnp.int32, (T, T), 0)
    col_id = lax.broadcasted_iota(jnp.int32, (T, T), 1)
    mask_bias = jnp.where(row_id >= col_id, 0.0, -1e30).astype(jnp.float32)

    # ---- per-(batch, head) attention -----------------------------------------
    # Static loop => static lane offsets; each iteration ends with a store into
    # cat_ref, which bounds the lifetime of its (T, T) intermediates.
    for b in range(BB):
        r0 = b * T
        for h in range(NUM_HEADS):
            c0 = h * HEAD_SIZE

            q = qkv_ref[r0:r0 + T, c0:c0 + HEAD_SIZE]                   # scale folded in
            k = qkv_ref[r0:r0 + T, C + c0:C + c0 + HEAD_SIZE]
            v = qkv_ref[r0:r0 + T, 2 * C + c0:2 * C + c0 + HEAD_SIZE]

            # q @ k^T without materializing a transpose: contract dim 1 of both.
            wei = lax.dot_general(q, k, (((1,), (1,)), ((), ())),
                                  preferred_element_type=jnp.float32)   # (T, T) f32
            wei = wei + mask_bias
            wei = wei - jnp.max(wei, axis=-1, keepdims=True)
            p = jnp.exp(wei)                                            # f32 softmax math
            inv_l = pl.reciprocal(jnp.sum(p, axis=-1, keepdims=True), approx=False)
            # TODO(synk): attention-weight dropout omitted (eval-mode identity).

            ov = jnp.dot(p.astype(COMPUTE_DTYPE), v,
                         preferred_element_type=jnp.float32)            # (T, hs) f32
            ov = ov * inv_l                          # deferred softmax normalization

            # store this head's slab; lane offset c0 == torch.cat ordering
            cat_ref[r0:r0 + T, c0:c0 + HEAD_SIZE] = ov.astype(cat_ref.dtype)

    # ---- single lane-dense K=C output projection + bias ----------------------
    proj = jnp.dot(cat_ref[...], wp_ref[...],
                   preferred_element_type=jnp.float32)                  # (rows, C) f32
    proj = proj + bp_ref[...]                                           # broadcast bias
    # TODO(synk): post-projection dropout omitted (eval-mode identity).
    o_ref[...] = proj.reshape(BB, T, C).astype(o_ref.dtype)


def _pick_batch_block(B, T, max_rows=1024):
    """Largest divisor of B with BB*T <= max_rows, keeping >= 2 grid steps so
    v7x's two TensorCores both get work on the 'parallel' axis."""
    if T % 8 != 0:
        return 1
    bb = max(1, min(B, max(1, max_rows // T)))
    bb = min(bb, max(1, B // 2))        # at least 2 grid steps when B >= 2
    while B % bb != 0:
        bb -= 1
    return bb


def pack_weights(wq, wk, wv, wp, bp):
    """Pack per-head projections once (not per call) into one lane-dense
    (C, 3C) weight with the softmax scale folded into the Q columns, and cast
    the matmul operands to COMPUTE_DTYPE."""
    C, H, hs = N_EMBED, NUM_HEADS, HEAD_SIZE
    scale = C ** -0.5   # NOTE: module scales by n_embed**-0.5, NOT head_size**-0.5

    def _pack(w):  # (H, C, hs) -> (C, H*hs), head-major columns
        return jnp.transpose(w, (1, 0, 2)).reshape(C, H * hs)

    wqkv = jnp.concatenate([_pack(wq) * scale, _pack(wk), _pack(wv)], axis=1)
    return (wqkv.astype(COMPUTE_DTYPE),
            wp.astype(COMPUTE_DTYPE),
            bp.reshape(1, C).astype(jnp.float32))


def multi_head_attention(x, wqkv, wp, bp2):
    """x: (B, T, C) f32. wqkv: (C, 3C) packed (from pack_weights). wp: (C, C)
    input-major. bp2: (1, C). Returns (B, T, C) f32."""
    B, T, C = x.shape
    assert C == N_EMBED and T <= BLOCK_SIZE

    BB = _pick_batch_block(B, T)
    grid = (B // BB,)

    xc = x.astype(COMPUTE_DTYPE)

    flops = B * (2 * T * C * (3 * C)                       # fused QKV projection
                 + NUM_HEADS * 4 * T * T * HEAD_SIZE       # scores + p@v
                 + 2 * T * C * C)                          # output projection
    bytes_accessed = (2 * B * T * C            # x (bf16)
                      + 2 * (3 * C * C + C * C)  # weights (bf16)
                      + 4 * C                    # bias
                      + 4 * B * T * C)           # output (f32)
    cost = pl.CostEstimate(flops=flops,
                           transcendentals=B * NUM_HEADS * T * T,
                           bytes_accessed=bytes_accessed)

    return pl.pallas_call(
        mha_kernel,
        out_shape=jax.ShapeDtypeStruct((B, T, C), jnp.float32),
        grid_spec=pltpu.PrefetchScalarGridSpec(
            num_scalar_prefetch=0,
            grid=grid,
            in_specs=[
                pl.BlockSpec((BB, T, C), lambda i: (i, 0, 0)),   # x
                pl.BlockSpec((C, 3 * C), lambda i: (0, 0)),      # packed Wqkv (grid-constant)
                pl.BlockSpec((C, C), lambda i: (0, 0)),          # Wproj (grid-constant)
                pl.BlockSpec((1, C), lambda i: (0, 0)),          # bproj
            ],
            out_specs=pl.BlockSpec((BB, T, C), lambda i: (i, 0, 0)),
            scratch_shapes=[
                pltpu.VMEM((BB * T, 3 * C), COMPUTE_DTYPE),      # fused qkv
                pltpu.VMEM((BB * T, C), COMPUTE_DTYPE),          # per-head concat
            ],
        ),
        compiler_params=pltpu.CompilerParams(
            dimension_semantics=("parallel",),
            vmem_limit_bytes=48 * 1024 * 1024,   # explicit budget: ok on v5e/v6e/v7x
        ),
        cost_estimate=cost,
    )(xc, wqkv, wp, bp2)


def reference_mha(x, wq, wk, wv, wp, bp):
    """Plain-JAX f32 reference mirroring the PyTorch forward (eval mode)."""
    B, T, C = x.shape
    scale = C ** -0.5
    mask = jnp.tril(jnp.ones((T, T), dtype=bool))
    outs = []
    for h in range(NUM_HEADS):
        q = x @ wq[h]
        k = x @ wk[h]
        v = x @ wv[h]
        wei = (q @ jnp.swapaxes(k, -2, -1)) * scale
        wei = jnp.where(mask[None], wei, -jnp.inf)
        wei = jax.nn.softmax(wei, axis=-1)
        outs.append(wei @ v)
    cat = jnp.concatenate(outs, axis=-1)
    return cat @ wp + bp[None, None, :]


if __name__ == "__main__":
    key = jax.random.PRNGKey(0)
    kx, kq, kk, kv, kp, kb = jax.random.split(key, 6)

    B, T = 2, 8
    x = jax.random.normal(kx, (B, T, N_EMBED), dtype=jnp.float32)

    # PyTorch-Linear-style uniform(-1/sqrt(fan_in), +1/sqrt(fan_in)), stored
    # input-major: (in_features, out_features).
    bound = 1.0 / jnp.sqrt(jnp.float32(N_EMBED))
    wq = jax.random.uniform(kq, (NUM_HEADS, N_EMBED, HEAD_SIZE), jnp.float32, -bound, bound)
    wk = jax.random.uniform(kk, (NUM_HEADS, N_EMBED, HEAD_SIZE), jnp.float32, -bound, bound)
    wv = jax.random.uniform(kv, (NUM_HEADS, N_EMBED, HEAD_SIZE), jnp.float32, -bound, bound)
    wp = jax.random.uniform(kp, (N_EMBED, N_EMBED), jnp.float32, -bound, bound)
    bp = jax.random.uniform(kb, (N_EMBED,), jnp.float32, -bound, bound)

    # Pack weights once (hoisted out of the per-call path).
    wqkv_p, wp_p, bp_p = pack_weights(wq, wk, wv, wp, bp)

    out = multi_head_attention(x, wqkv_p, wp_p, bp_p)
    out = jax.block_until_ready(out)

    ref = reference_mha(x, wq, wk, wv, wp, bp)
    assert out.shape == (B, T, N_EMBED)
    # bf16 MXU operands vs. f32 reference -> relaxed tolerance.
    assert jnp.allclose(out, ref, atol=2e-2, rtol=2e-2), "kernel/reference mismatch"

    print("KERNEL_OK")
</pallas_src>

<mosaic_0001>
module attributes {stable_mosaic.version = 11 : i64} {
  func.func @mha_kernel(%arg0: i32, %arg1: memref<1x8x384xbf16, #tpu.memory_space<vmem>>, %arg2: memref<384x1152xbf16, #tpu.memory_space<vmem>>, %arg3: memref<384x384xbf16, #tpu.memory_space<vmem>>, %arg4: memref<1x384xf32, #tpu.memory_space<vmem>>, %arg5: memref<1x8x384xf32, #tpu.memory_space<vmem>>, %arg6: memref<8x1152xbf16, #tpu.memory_space<vmem>>, %arg7: memref<8x384xbf16, #tpu.memory_space<vmem>>) attributes {dimension_semantics = [#tpu.dimension_semantics<parallel>], iteration_bounds = array<i64: 2>, scalar_prefetch = 0 : i64, scratch_operands = 2 : i64, tpu.core_type = #tpu.core_type<tc>, window_params = [{transform_indices = @transform_0, window_bounds = array<i64: 1, 8, 384>}, {pipeline_mode = #tpu.pipeline_mode<synchronous>, transform_indices = @transform_1, window_bounds = array<i64: 384, 1152>}, {pipeline_mode = #tpu.pipeline_mode<synchronous>, transform_indices = @transform_2, window_bounds = array<i64: 384, 384>}, {pipeline_mode = #tpu.pipeline_mode<synchronous>, transform_indices = @transform_3, window_bounds = array<i64: 1, 384>}, {transform_indices = @transform_4, window_bounds = array<i64: 1, 8, 384>}]} {
    %c0 = arith.constant 0 : index
    %c0_0 = arith.constant 0 : index
    %c0_1 = arith.constant 0 : index
    %0 = vector.load %arg1[%c0, %c0_0, %c0_1] : memref<1x8x384xbf16, #tpu.memory_space<vmem>>, vector<1x8x384xbf16>
    %1 = vector.shape_cast %0 : vector<1x8x384xbf16> to vector<8x384xbf16>
    %c0_2 = arith.constant 0 : index
    %c0_3 = arith.constant 0 : index
    %2 = vector.load %arg2[%c0_2, %c0_3] : memref<384x1152xbf16, #tpu.memory_space<vmem>>, vector<384x1152xbf16>
    %cst = arith.constant dense<0.000000e+00> : vector<8x1152xf32>
    %3 = tpu.matmul %1, %2, %cst {dimension_numbers = #tpu.dot_dimension_numbers<[1], [0], [0], [1], [0, 0, 1, 1], [], []>} : vector<8x384xbf16>, vector<384x1152xbf16>, vector<8x1152xf32> -> vector<8x1152xf32>
    %4 = arith.truncf %3 : vector<8x1152xf32> to vector<8x1152xbf16>
    %c0_4 = arith.constant 0 : index
    %c0_5 = arith.constant 0 : index
    %5 = vector.load %arg6[%c0_4, %c0_5] : memref<8x1152xbf16, #tpu.memory_space<vmem>>, vector<8x1152xbf16>
    tpu.vector_store %arg6[%c0_4, %c0_5], %4 {strides = array<i32>} : memref<8x1152xbf16, #tpu.memory_space<vmem>>, vector<8x1152xbf16>,
    %6 = tpu.iota {dimensions = array<i32: 0>} : vector<8x8xi32>
    %7 = tpu.iota {dimensions = array<i32: 1>} : vector<8x8xi32>
    %8 = arith.cmpi sge, %6, %7 : vector<8x8xi32>
    %cst_6 = arith.constant 0.000000e+00 : f32
    %cst_7 = arith.constant -1.000000e+30 : f32
    %9 = vector.broadcast %cst_6 : f32 to vector<8x8xf32>
    %10 = vector.broadcast %cst_7 : f32 to vector<8x8xf32>
    %11 = arith.select %8, %9, %10 : vector<8x8xi1>, vector<8x8xf32>
    %c0_8 = arith.constant 0 : index
    %c0_9 = arith.constant 0 : index
    %12 = vector.load %arg6[%c0_8, %c0_9] : memref<8x1152xbf16, #tpu.memory_space<vmem>>, vector<8x64xbf16>
    %c0_10 = arith.constant 0 : index
    %c384 = arith.constant 384 : index
    %13 = vector.load %arg6[%c0_10, %c384] : memref<8x1152xbf16, #tpu.memory_space<vmem>>, vector<8x64xbf16>
    %c0_11 = arith.constant 0 : index
    %c768 = arith.constant 768 : index
    %14 = vector.load %arg6[%c0_11, %c768] : memref<8x1152xbf16, #tpu.memory_space<vmem>>, vector<8x64xbf16>
    %cst_12 = arith.constant dense<0.000000e+00> : vector<8x8xf32>
    %15 = tpu.matmul %12, %13, %cst_12 {dimension_numbers = #tpu.dot_dimension_numbers<[1], [1], [0], [0], [0, 0, 1, 0], [], []>} : vector<8x64xbf16>, vector<8x64xbf16>, vector<8x8xf32> -> vector<8x8xf32>
    %16 = arith.addf %15, %11 : vector<8x8xf32>
    %cst_13 = arith.constant dense<0xFF800000> : vector<8xf32>
    %17 = vector.multi_reduction <maximumf>, %16, %cst_13 [1] : vector<8x8xf32> to vector<8xf32>
    %18 = vector.shape_cast %17 : vector<8xf32> to vector<8x1xf32>
    %19 = vector.broadcast %18 : vector<8x1xf32> to vector<8x8xf32>
    %20 = arith.subf %16, %19 : vector<8x8xf32>
    %21 = math.exp %20 : vector<8x8xf32>
    %cst_14 = arith.constant dense<0.000000e+00> : vector<8xf32>
    %22 = vector.multi_reduction <add>, %21, %cst_14 [1] : vector<8x8xf32> to vector<8xf32>
    %23 = vector.shape_cast %22 : vector<8xf32> to vector<8x1xf32>
    %24 = tpu.reciprocal %23 : vector<8x1xf32> -> vector<8x1xf32>
    %25 = arith.truncf %21 : vector<8x8xf32> to vector<8x8xbf16>
    %cst_15 = arith.constant dense<0.000000e+00> : vector<8x64xf32>
    %26 = tpu.matmul %25, %14, %cst_15 {dimension_numbers = #tpu.dot_dimension_numbers<[1], [0], [0], [1], [0, 0, 1, 1], [], []>} : vector<8x8xbf16>, vector<8x64xbf16>, vector<8x64xf32> -> vector<8x64xf32>
    %27 = vector.broadcast %24 : vector<8x1xf32> to vector<8x64xf32>
    %28 = arith.mulf %26, %27 : vector<8x64xf32>
    %29 = arith.truncf %28 : vector<8x64xf32> to vector<8x64xbf16>
    %c0_16 = arith.constant 0 : index
    %c0_17 = arith.constant 0 : index
    %30 = vector.load %arg7[%c0_16, %c0_17] : memref<8x384xbf16, #tpu.memory_space<vmem>>, vector<8x64xbf16>
    tpu.vector_store %arg7[%c0_16, %c0_17], %29 {strides = array<i32>} : memref<8x384xbf16, #tpu.memory_space<vmem>>, vector<8x64xbf16>,
    %c0_18 = arith.constant 0 : index
    %c64 = arith.constant 64 : index
    %31 = vector.load %arg6[%c0_18, %c64] : memref<8x1152xbf16, #tpu.memory_space<vmem>>, vector<8x64xbf16>
    %c0_19 = arith.constant 0 : index
    %c448 = arith.constant 448 : index
    %32 = vector.load %arg6[%c0_19, %c448] : memref<8x1152xbf16, #tpu.memory_space<vmem>>, vector<8x64xbf16>
    %c0_20 = arith.constant 0 : index
    %c832 = arith.constant 832 : index
    %33 = vector.load %arg6[%c0_20, %c832] : memref<8x1152xbf16, #tpu.memory_space<vmem>>, vector<8x64xbf16>
    %cst_21 = arith.constant dense<0.000000e+00> : vector<8x8xf32>
    %34 = tpu.matmul %31, %32, %cst_21 {dimension_numbers = #tpu.dot_dimension_numbers<[1], [1], [0], [0], [0, 0, 1, 0], [], []>} : vector<8x64xbf16>, vector<8x64xbf16>, vector<8x8xf32> -> vector<8x8xf32>
    %35 = arith.addf %34, %11 : vector<8x8xf32>
    %cst_22 = arith.constant dense<0xFF800000> : vector<8xf32>
    %36 = vector.multi_reduction <maximumf>, %35, %cst_22 [1] : vector<8x8xf32> to vector<8xf32>
    %37 = vector.shape_cast %36 : vector<8xf32> to vector<8x1xf32>
    %38 = vector.broadcast %37 : vector<8x1xf32> to vector<8x8xf32>
    %39 = arith.subf %35, %38 : vector<8x8xf32>
    %40 = math.exp %39 : vector<8x8xf32>
    %cst_23 = arith.constant dense<0.000000e+00> : vector<8xf32>
    %41 = vector.multi_reduction <add>, %40, %cst_23 [1] : vector<8x8xf32> to vector<8xf32>
    %42 = vector.shape_cast %41 : vector<8xf32> to vector<8x1xf32>
    %43 = tpu.reciprocal %42 : vector<8x1xf32> -> vector<8x1xf32>
    %44 = arith.truncf %40 : vector<8x8xf32> to vector<8x8xbf16>
    %cst_24 = arith.constant dense<0.000000e+00> : vector<8x64xf32>
    %45 = tpu.matmul %44, %33, %cst_24 {dimension_numbers = #tpu.dot_dimension_numbers<[1], [0], [0], [1], [0, 0, 1, 1], [], []>} : vector<8x8xbf16>, vector<8x64xbf16>, vector<8x64xf32> -> vector<8x64xf32>
    %46 = vector.broadcast %43 : vector<8x1xf32> to vector<8x64xf32>
    %47 = arith.mulf %45, %46 : vector<8x64xf32>
    %48 = arith.truncf %47 : vector<8x64xf32> to vector<8x64xbf16>
    %c0_25 = arith.constant 0 : index
    %c64_26 = arith.constant 64 : index
    %49 = vector.load %arg7[%c0_25, %c64_26] : memref<8x384xbf16, #tpu.memory_space<vmem>>, vector<8x64xbf16>
    tpu.vector_store %arg7[%c0_25, %c64_26], %48 {strides = array<i32>} : memref<8x384xbf16, #tpu.memory_space<vmem>>, vector<8x64xbf16>,
    %c0_27 = arith.constant 0 : index
    %c128 = arith.constant 128 : index
    %50 = vector.load %arg6[%c0_27, %c128] : memref<8x1152xbf16, #tpu.memory_space<vmem>>, vector<8x64xbf16>
    %c0_28 = arith.constant 0 : index
    %c512 = arith.constant 512 : index
    %51 = vector.load %arg6[%c0_28, %c512] : memref<8x1152xbf16, #tpu.memory_space<vmem>>, vector<8x64xbf16>
    %c0_29 = arith.constant 0 : index
    %c896 = arith.constant 896 : index
    %52 = vector.load %arg6[%c0_29, %c896] : memref<8x1152xbf16, #tpu.memory_space<vmem>>, vector<8x64xbf16>
    %cst_30 = arith.constant dense<0.000000e+00> : vector<8x8xf32>
    %53 = tpu.matmul %50, %51, %cst_30 {dimension_numbers = #tpu.dot_dimension_numbers<[1], [1], [0], [0], [0, 0, 1, 0], [], []>} : vector<8x64xbf16>, vector<8x64xbf16>, vector<8x8xf32> -> vector<8x8xf32>
    %54 = arith.addf %53, %11 : vector<8x8xf32>
    %cst_31 = arith.constant dense<0xFF800000> : vector<8xf32>
    %55 = vector.multi_reduction <maximumf>, %54, %cst_31 [1] : vector<8x8xf32> to vector<8xf32>
    %56 = vector.shape_cast %55 : vector<8xf32> to vector<8x1xf32>
    %57 = vector.broadcast %56 : vector<8x1xf32> to vector<8x8xf32>
    %58 = arith.subf %54, %57 : vector<8x8xf32>
    %59 = math.exp %58 : vector<8x8xf32>
    %cst_32 = arith.constant dense<0.000000e+00> : vector<8xf32>
    %60 = vector.multi_reduction <add>, %59, %cst_32 [1] : vector<8x8xf32> to vector<8xf32>
    %61 = vector.shape_cast %60 : vector<8xf32> to vector<8x1xf32>
    %62 = tpu.reciprocal %61 : vector<8x1xf32> -> vector<8x1xf32>
    %63 = arith.truncf %59 : vector<8x8xf32> to vector<8x8xbf16>
    %cst_33 = arith.constant dense<0.000000e+00> : vector<8x64xf32>
    %64 = tpu.matmul %63, %52, %cst_33 {dimension_numbers = #tpu.dot_dimension_numbers<[1], [0], [0], [1], [0, 0, 1, 1], [], []>} : vector<8x8xbf16>, vector<8x64xbf16>, vector<8x64xf32> -> vector<8x64xf32>
    %65 = vector.broadcast %62 : vector<8x1xf32> to vector<8x64xf32>
    %66 = arith.mulf %64, %65 : vector<8x64xf32>
    %67 = arith.truncf %66 : vector<8x64xf32> to vector<8x64xbf16>
    %c0_34 = arith.constant 0 : index
    %c128_35 = arith.constant 128 : index
    %68 = vector.load %arg7[%c0_34, %c128_35] : memref<8x384xbf16, #tpu.memory_space<vmem>>, vector<8x64xbf16>
    tpu.vector_store %arg7[%c0_34, %c128_35], %67 {strides = array<i32>} : memref<8x384xbf16, #tpu.memory_space<vmem>>, vector<8x64xbf16>,
    %c0_36 = arith.constant 0 : index
    %c192 = arith.constant 192 : index
    %69 = vector.load %arg6[%c0_36, %c192] : memref<8x1152xbf16, #tpu.memory_space<vmem>>, vector<8x64xbf16>
    %c0_37 = arith.constant 0 : index
    %c576 = arith.constant 576 : index
    %70 = vector.load %arg6[%c0_37, %c576] : memref<8x1152xbf16, #tpu.memory_space<vmem>>, vector<8x64xbf16>
    %c0_38 = arith.constant 0 : index
    %c960 = arith.constant 960 : index
    %71 = vector.load %arg6[%c0_38, %c960] : memref<8x1152xbf16, #tpu.memory_space<vmem>>, vector<8x64xbf16>
    %cst_39 = arith.constant dense<0.000000e+00> : vector<8x8xf32>
    %72 = tpu.matmul %69, %70, %cst_39 {dimension_numbers = #tpu.dot_dimension_numbers<[1], [1], [0], [0], [0, 0, 1, 0], [], []>} : vector<8x64xbf16>, vector<8x64xbf16>, vector<8x8xf32> -> vector<8x8xf32>
    %73 = arith.addf %72, %11 : vector<8x8xf32>
    %cst_40 = arith.constant dense<0xFF800000> : vector<8xf32>
    %74 = vector.multi_reduction <maximumf>, %73, %cst_40 [1] : vector<8x8xf32> to vector<8xf32>
    %75 = vector.shape_cast %74 : vector<8xf32> to vector<8x1xf32>
    %76 = vector.broadcast %75 : vector<8x1xf32> to vector<8x8xf32>
    %77 = arith.subf %73, %76 : vector<8x8xf32>
    %78 = math.exp %77 : vector<8x8xf32>
    %cst_41 = arith.constant dense<0.000000e+00> : vector<8xf32>
    %79 = vector.multi_reduction <add>, %78, %cst_41 [1] : vector<8x8xf32> to vector<8xf32>
    %80 = vector.shape_cast %79 : vector<8xf32> to vector<8x1xf32>
    %81 = tpu.reciprocal %80 : vector<8x1xf32> -> vector<8x1xf32>
    %82 = arith.truncf %78 : vector<8x8xf32> to vector<8x8xbf16>
    %cst_42 = arith.constant dense<0.000000e+00> : vector<8x64xf32>
    %83 = tpu.matmul %82, %71, %cst_42 {dimension_numbers = #tpu.dot_dimension_numbers<[1], [0], [0], [1], [0, 0, 1, 1], [], []>} : vector<8x8xbf16>, vector<8x64xbf16>, vector<8x64xf32> -> vector<8x64xf32>
    %84 = vector.broadcast %81 : vector<8x1xf32> to vector<8x64xf32>
    %85 = arith.mulf %83, %84 : vector<8x64xf32>
    %86 = arith.truncf %85 : vector<8x64xf32> to vector<8x64xbf16>
    %c0_43 = arith.constant 0 : index
    %c192_44 = arith.constant 192 : index
    %87 = vector.load %arg7[%c0_43, %c192_44] : memref<8x384xbf16, #tpu.memory_space<vmem>>, vector<8x64xbf16>
    tpu.vector_store %arg7[%c0_43, %c192_44], %86 {strides = array<i32>} : memref<8x384xbf16, #tpu.memory_space<vmem>>, vector<8x64xbf16>,
    %c0_45 = arith.constant 0 : index
    %c256 = arith.constant 256 : index
    %88 = vector.load %arg6[%c0_45, %c256] : memref<8x1152xbf16, #tpu.memory_space<vmem>>, vector<8x64xbf16>
    %c0_46 = arith.constant 0 : index
    %c640 = arith.constant 640 : index
    %89 = vector.load %arg6[%c0_46, %c640] : memref<8x1152xbf16, #tpu.memory_space<vmem>>, vector<8x64xbf16>
    %c0_47 = arith.constant 0 : index
    %c1024 = arith.constant 1024 : index
    %90 = vector.load %arg6[%c0_47, %c1024] : memref<8x1152xbf16, #tpu.memory_space<vmem>>, vector<8x64xbf16>
    %cst_48 = arith.constant dense<0.000000e+00> : vector<8x8xf32>
    %91 = tpu.matmul %88, %89, %cst_48 {dimension_numbers = #tpu.dot_dimension_numbers<[1], [1], [0], [0], [0, 0, 1, 0], [], []>} : vector<8x64xbf16>, vector<8x64xbf16>, vector<8x8xf32> -> vector<8x8xf32>
    %92 = arith.addf %91, %11 : vector<8x8xf32>
    %cst_49 = arith.constant dense<0xFF800000> : vector<8xf32>
    %93 = vector.multi_reduction <maximumf>, %92, %cst_49 [1] : vector<8x8xf32> to vector<8xf32>
    %94 = vector.shape_cast %93 : vector<8xf32> to vector<8x1xf32>
    %95 = vector.broadcast %94 : vector<8x1xf32> to vector<8x8xf32>
    %96 = arith.subf %92, %95 : vector<8x8xf32>
    %97 = math.exp %96 : vector<8x8xf32>
    %cst_50 = arith.constant dense<0.000000e+00> : vector<8xf32>
    %98 = vector.multi_reduction <add>, %97, %cst_50 [1] : vector<8x8xf32> to vector<8xf32>
    %99 = vector.shape_cast %98 : vector<8xf32> to vector<8x1xf32>
    %100 = tpu.reciprocal %99 : vector<8x1xf32> -> vector<8x1xf32>
    %101 = arith.truncf %97 : vector<8x8xf32> to vector<8x8xbf16>
    %cst_51 = arith.constant dense<0.000000e+00> : vector<8x64xf32>
    %102 = tpu.matmul %101, %90, %cst_51 {dimension_numbers = #tpu.dot_dimension_numbers<[1], [0], [0], [1], [0, 0, 1, 1], [], []>} : vector<8x8xbf16>, vector<8x64xbf16>, vector<8x64xf32> -> vector<8x64xf32>
    %103 = vector.broadcast %100 : vector<8x1xf32> to vector<8x64xf32>
    %104 = arith.mulf %102, %103 : vector<8x64xf32>
    %105 = arith.truncf %104 : vector<8x64xf32> to vector<8x64xbf16>
    %c0_52 = arith.constant 0 : index
    %c256_53 = arith.constant 256 : index
    %106 = vector.load %arg7[%c0_52, %c256_53] : memref<8x384xbf16, #tpu.memory_space<vmem>>, vector<8x64xbf16>
    tpu.vector_store %arg7[%c0_52, %c256_53], %105 {strides = array<i32>} : memref<8x384xbf16, #tpu.memory_space<vmem>>, vector<8x64xbf16>,
    %c0_54 = arith.constant 0 : index
    %c320 = arith.constant 320 : index
    %107 = vector.load %arg6[%c0_54, %c320] : memref<8x1152xbf16, #tpu.memory_space<vmem>>, vector<8x64xbf16>
    %c0_55 = arith.constant 0 : index
    %c704 = arith.constant 704 : index
    %108 = vector.load %arg6[%c0_55, %c704] : memref<8x1152xbf16, #tpu.memory_space<vmem>>, vector<8x64xbf16>
    %c0_56 = arith.constant 0 : index
    %c1088 = arith.constant 1088 : index
    %109 = vector.load %arg6[%c0_56, %c1088] : memref<8x1152xbf16, #tpu.memory_space<vmem>>, vector<8x64xbf16>
    %cst_57 = arith.constant dense<0.000000e+00> : vector<8x8xf32>
    %110 = tpu.matmul %107, %108, %cst_57 {dimension_numbers = #tpu.dot_dimension_numbers<[1], [1], [0], [0], [0, 0, 1, 0], [], []>} : vector<8x64xbf16>, vector<8x64xbf16>, vector<8x8xf32> -> vector<8x8xf32>
    %111 = arith.addf %110, %11 : vector<8x8xf32>
    %cst_58 = arith.constant dense<0xFF800000> : vector<8xf32>
    %112 = vector.multi_reduction <maximumf>, %111, %cst_58 [1] : vector<8x8xf32> to vector<8xf32>
    %113 = vector.shape_cast %112 : vector<8xf32> to vector<8x1xf32>
    %114 = vector.broadcast %113 : vector<8x1xf32> to vector<8x8xf32>
    %115 = arith.subf %111, %114 : vector<8x8xf32>
    %116 = math.exp %115 : vector<8x8xf32>
    %cst_59 = arith.constant dense<0.000000e+00> : vector<8xf32>
    %117 = vector.multi_reduction <add>, %116, %cst_59 [1] : vector<8x8xf32> to vector<8xf32>
    %118 = vector.shape_cast %117 : vector<8xf32> to vector<8x1xf32>
    %119 = tpu.reciprocal %118 : vector<8x1xf32> -> vector<8x1xf32>
    %120 = arith.truncf %116 : vector<8x8xf32> to vector<8x8xbf16>
    %cst_60 = arith.constant dense<0.000000e+00> : vector<8x64xf32>
    %121 = tpu.matmul %120, %109, %cst_60 {dimension_numbers = #tpu.dot_dimension_numbers<[1], [0], [0], [1], [0, 0, 1, 1], [], []>} : vector<8x8xbf16>, vector<8x64xbf16>, vector<8x64xf32> -> vector<8x64xf32>
    %122 = vector.broadcast %119 : vector<8x1xf32> to vector<8x64xf32>
    %123 = arith.mulf %121, %122 : vector<8x64xf32>
    %124 = arith.truncf %123 : vector<8x64xf32> to vector<8x64xbf16>
    %c0_61 = arith.constant 0 : index
    %c320_62 = arith.constant 320 : index
    %125 = vector.load %arg7[%c0_61, %c320_62] : memref<8x384xbf16, #tpu.memory_space<vmem>>, vector<8x64xbf16>
    tpu.vector_store %arg7[%c0_61, %c320_62], %124 {strides = array<i32>} : memref<8x384xbf16, #tpu.memory_space<vmem>>, vector<8x64xbf16>,
    %c0_63 = arith.constant 0 : index
    %c0_64 = arith.constant 0 : index
    %126 = vector.load %arg7[%c0_63, %c0_64] : memref<8x384xbf16, #tpu.memory_space<vmem>>, vector<8x384xbf16>
    %c0_65 = arith.constant 0 : index
    %c0_66 = arith.constant 0 : index
    %127 = vector.load %arg3[%c0_65, %c0_66] : memref<384x384xbf16, #tpu.memory_space<vmem>>, vector<384x384xbf16>
    %cst_67 = arith.constant dense<0.000000e+00> : vector<8x384xf32>
    %128 = tpu.matmul %126, %127, %cst_67 {dimension_numbers = #tpu.dot_dimension_numbers<[1], [0], [0], [1], [0, 0, 1, 1], [], []>} : vector<8x384xbf16>, vector<384x384xbf16>, vector<8x384xf32> -> vector<8x384xf32>
    %c0_68 = arith.constant 0 : index
    %c0_69 = arith.constant 0 : index
    %129 = vector.load %arg4[%c0_68, %c0_69] : memref<1x384xf32, #tpu.memory_space<vmem>>, vector<1x384xf32>
    %130 = vector.broadcast %129 : vector<1x384xf32> to vector<8x384xf32>
    %131 = arith.addf %128, %130 : vector<8x384xf32>
    %132 = vector.shape_cast %131 : vector<8x384xf32> to vector<1x8x384xf32>
    %c0_70 = arith.constant 0 : index
    %c0_71 = arith.constant 0 : index
    %c0_72 = arith.constant 0 : index
    %133 = vector.load %arg5[%c0_70, %c0_71, %c0_72] : memref<1x8x384xf32, #tpu.memory_space<vmem>>, vector<1x8x384xf32>
    tpu.vector_store %arg5[%c0_70, %c0_71, %c0_72], %132 {strides = array<i32>} : memref<1x8x384xf32, #tpu.memory_space<vmem>>, vector<1x8x384xf32>,
    return
  }
  func.func @transform_0(%arg0: i32) -> (i32, i32, i32) {
    %c0_i32 = arith.constant 0 : i32
    %c0_i32_0 = arith.constant 0 : i32
    %c0_i32_1 = arith.constant 0 : i32
    return %arg0, %c0_i32, %c0_i32_0 : i32, i32, i32
  }
  func.func @transform_1(%arg0: i32) -> (i32, i32) {
    %c0_i32 = arith.constant 0 : i32
    %c0_i32_0 = arith.constant 0 : i32
    %c0_i32_1 = arith.constant 0 : i32
    return %c0_i32, %c0_i32_0 : i32, i32
  }
  func.func @transform_2(%arg0: i32) -> (i32, i32) {
    %c0_i32 = arith.constant 0 : i32
    %c0_i32_0 = arith.constant 0 : i32
    %c0_i32_1 = arith.constant 0 : i32
    return %c0_i32, %c0_i32_0 : i32, i32
  }
  func.func @transform_3(%arg0: i32) -> (i32, i32) {
    %c0_i32 = arith.constant 0 : i32
    %c0_i32_0 = arith.constant 0 : i32
    %c0_i32_1 = arith.constant 0 : i32
    return %c0_i32, %c0_i32_0 : i32, i32
  }
  func.func @transform_4(%arg0: i32) -> (i32, i32, i32) {
    %c0_i32 = arith.constant 0 : i32
    %c0_i32_0 = arith.constant 0 : i32
    %c0_i32_1 = arith.constant 0 : i32
    return %arg0, %c0_i32, %c0_i32_0 : i32, i32, i32
  }
}

</mosaic_0001>

<bundles_post_ra>
// kernel: tpu_custom_call.1
= control target key start
LH: loop header
LB: loop body
LE: loop exit
PB: predicated region body
PF: predicated region fallthrough
CT: control target
= control target key end

     0   :  { %9 = vsyncpa [#allocation5], 0  ;;  %s5258_s0 = inlined_call_operand.hbm [shape: bf16[2,8,384], index: 0, kind: input, shape index: {}]   ;;  %s5259_s1 = inlined_call_operand.hbm [shape: bf16[384,1152], index: 1, kind: input, shape index: {}]   ;;  %s5260_s2 = inlined_call_operand.hbm [shape: bf16[384,384], index: 2, kind: input, shape index: {}]   ;;  %s5261_s3 = inlined_call_operand.vmem [shape: f32[1,384], index: 3, kind: input, shape index: {}]   ;;  %s5262_s4 = inlined_call_operand.hbm [shape: f32[2,8,384], index: 4, kind: output, shape index: {}]  }
   0x1   :  { %11 = vsyncpa [#allocation5 + $0x1], 0 }
   0x2   :  { %12 = vsyncpa [#allocation8], 0 }
   0x3   :  { %13 = vsyncpa [#allocation6], 0 }
   0x4   :  { %15 = vsyncpa [#allocation6 + $0x1], 0  ;;  %s4845_s15 = smov 0   ;;  %s4847_s16 = smov 0  }
   0x5   :  { %s4849_s17 = smov 0   ;;  %s4851_s18 = smov 0  }
   0x6 LB: > { %s4866_s19 = sadd.s32 4294967295, %s4805_s18   ;;  %s3558_s20 = sadd.s32 4294967294, %s4805_s18   ;;  %s4805_s18 = sphi %s4851_s18, %s5282_s18   ;;  %s4801_s17 = sphi %s4849_s17, %s5281_s17   ;;  %s4797_s16 = sphi %s4847_s16, %s5280_s16   ;;  %s4793_s15 = sphi %s4845_s15, %s5279_s15  }
   0x7   : > { %p41_p0 = scmp.ne.s32.totalorder %s4797_s16, %s4793_s15  ;;  %p5263_p1 = scmp.eq.s32.totalorder %s4866_s19, 0 }
   0x8   : > { %p134_p3 = scmp.eq.s32.totalorder %s3558_s20, 1  ;;  %p3559_p5 = scmp.ge.s32.totalorder %s4805_s18, 1 }
   0x9   : > { %p4875_p4 = por %p5263_p1, %p41_p0  ;;  %p141_p7 = scmp.lt.s32.totalorder %s4805_s18, 3 }
   0xa   : > { %p4880_p6 = por %p134_p3, %p41_p0  ;;  %s4807_s24 = smov [#allocation7]  }
   0xb   : > { %s5266_s21 = scalar_select %p4875_p4, 1, 0 }
   0xc   : > { %s5267_s22 = scalar_select %p4880_p6, 1, 0 }
   0xd   : > { %p4885_p8 = pnand %p3559_p5, %p141_p7  ;;  %s153_s25 = sshll.u32 %s4807_s24, 4  ;;  %s4889_s25 = int_to_ptr.vmem [resolvable:$true] %s153_s25 }
   0xe   : > { %s4808_s27 = smov [#allocation9]   ;;  %s4649_s5 = scalar_lea.hbm %s5259_s1, 27648 }
   0xf   : > { %p4138_p9 = pneg %p4885_p8  ;;  %s166_s28 = sshll.u32 %s4808_s27, 4  ;;  %s4900_s28 = int_to_ptr.vmem [resolvable:$true] %s166_s28 }
  0x10   : > { %p4650_p12 = scmp.ne.s32.totalorder %s5259_s1, %s4649_s5  ;;  %p4656_p5 = scmp.lt.u32.totalorder %s4649_s5, %s5259_s1 }
  0x11   : > { %p4896_p11 = pnand %p4138_p9, %p5263_p1 }
  0x13   : > { %p4651_p13 = pneg %p4896_p11 }
  0x15   : > { %p4652_p0 = pnand %p4651_p13, %p4650_p12 }
  0x17   : > { %p4653_p3 = pneg %p4652_p0 }
  0x19   : > { %p4658_p7 = pnand %p4656_p5, %p4653_p3 }
  0x1b   : > { %4661 = shalt.err (!%p4658_p7)
}
  0x1c   : > { %s4662_s10 = scalar_lea.vmem %s4889_s25, 27648  ;;  %p4670_p2 = scmp.lt.s32.totalorder %s4889_s25, %s4889_s25 }
  0x1d   : > { %p4663_p9 = scmp.ne.s32.totalorder %s4889_s25, %s4662_s10  ;;  %p4671_p12 = scmp.lt.s32.totalorder %s4662_s10, %s4662_s10 }
  0x1f   : > { %p4665_p10 = pnand %p4663_p9, %p4651_p13  ;;  %p4672_p0 = por %p4671_p12, %p4670_p2 }
  0x21   : > { %p4666_p1 = pneg %p4665_p10 }
  0x23   : > { %p4673_p6 = pnand %p4672_p0, %p4666_p1 }
  0x25   : > { %4676 = shalt.err (!%p4673_p6)
}
  0x26   : > { %s4809_s11 = smov 576   ;;  %s4810_s12 = smov 36  }
  0x27   : > { %4141 = dma.hbm_to_vmem [thread:$0]  (!%p4896_p11), %s5259_s1, 27648, %s4889_s25, [#allocation8], %s4809_s11, %s4809_s11, %s4810_s12  }
  0x28   : > { %s4677_s27 = scalar_lea.hbm %s5260_s2, 9216 }
  0x29   : > { %p4678_p2 = scmp.ne.s32.totalorder %s5260_s2, %s4677_s27  ;;  %p4684_p10 = scmp.lt.u32.totalorder %s4677_s27, %s5260_s2 }
  0x2b   : > { %p4680_p1 = pnand %p4678_p2, %p4651_p13 }
  0x2d   : > { %p4681_p6 = pneg %p4680_p1 }
  0x2f   : > { %p4686_p3 = pnand %p4684_p10, %p4681_p6 }
  0x31   : > { %4689 = shalt.err (!%p4686_p3)
}
  0x32   : > { %s4690_s25 = scalar_lea.vmem %s4900_s28, 9216  ;;  %p4698_p12 = scmp.lt.s32.totalorder %s4900_s28, %s4900_s28 }
  0x33   : > { %p4691_p5 = scmp.ne.s32.totalorder %s4900_s28, %s4690_s25  ;;  %p4699_p0 = scmp.lt.s32.totalorder %s4690_s25, %s4690_s25 }
  0x35   : > { %p4693_p7 = pnand %p4691_p5, %p4651_p13  ;;  %p4700_p2 = por %p4699_p0, %p4698_p12 }
  0x37   : > { %p4694_p9 = pneg %p4693_p7 }
  0x39   : > { %p4701_p1 = pnand %p4700_p2, %p4694_p9 }
  0x3b   : > { %4704 = shalt.err (!%p4701_p1)
}
  0x3c   : > { %s4811_s7 = smov 192   ;;  %s4812_s8 = smov 12  }
  0x3d   : > { %4144 = dma.hbm_to_vmem [thread:$0]  (!%p4896_p11), %s5260_s2, 9216, %s4900_s28, [#allocation8], %s4811_s7, %s4811_s7, %s4812_s8  }
  0x3e   : > { %s4955_s11 = sadd.s32 1, %s4805_s18   ;;  %s28_s13 = sadd.s32 1, %s4801_s17 }
  0x3f   : > { %s25_s12 = ssub.s32 %s4805_s18, %s4955_s11  ;;  %p35_p6 = scmp.ne.s32.totalorder %s4801_s17, %s4797_s16 }
  0x40   : > { %p26_p13 = scmp.eq.s32.totalorder %s25_s12, 0  ;;  %p36_p10 = scmp.eq.s32.totalorder %s4805_s18, 0 }
  0x41   : > { %p5270_p5 = scmp.eq.s32.totalorder %s4866_s19, 1  ;;  %p4155_p9 = scmp.lt.s32.totalorder %s4805_s18, 2 }
  0x42   : > { %s4964_s14 = scalar_select %p26_p13, %s4801_s17, %s28_s13  }
  0x43   : > { %p37_p3 = por %p36_p10, %p35_p6  ;;  %p4968_p7 = por %p5270_p5, %p35_p6 }
  0x44   : > { %s183_s26 = sand.u32 1, %s4801_s17   ;;  %s4122_s28 = smul.u32 192, %s4805_s18 }
  0x45   : > { %s5271_s20 = scalar_select %p4968_p7, 1, 0 }
  0x46   : > { %s4121_s24 = smul.u32 12, %s183_s26  ;;  %p4975_p11 = pnand %p4155_p9, %p37_p3 }
  0x47   : > { %s4982_s5 = scalar_lea.hbm %s5258_s0, %s4122_s28  ;;  %s184_s7 = scalar_lea.sflag [#allocation5], %s183_s26 }
  0x48   : > { %s187_s6 = scalar_lea.vmem [#allocation4], %s4121_s24  ;;  %s4705_s8 = scalar_lea.hbm %s4982_s5, 192 }
  0x49   : > { %s195_s25 = sshll.u32 %s187_s6, 4  ;;  %p4706_p12 = scmp.ne.s32.totalorder %s4982_s5, %s4705_s8  ;;  %s4984_s25 = int_to_ptr.vmem [resolvable:$true] %s195_s25 }
  0x4a   : > { %p4707_p0 = pneg %p4975_p11  ;;  %s4710_s12 = scalar_lea.hbm %s5258_s0, 384 }
  0x4b   : > { %p4711_p13 = scmp.lt.u32.totalorder %s4982_s5, %s5258_s0  ;;  %p4712_p6 = scmp.lt.u32.totalorder %s4710_s12, %s4705_s8 }
  0x4c   : > { %p4708_p2 = pnand %p4707_p0, %p4706_p12  ;;  %p4714_p3 = scmp.lt.u32.totalorder %s4705_s8, %s4982_s5 }
  0x4d   : > { %p4713_p10 = por %p4712_p6, %p4711_p13 }
  0x4e   : > { %p4709_p1 = pneg %p4708_p2 }
  0x4f   : > { %p4715_p5 = por %p4714_p3, %p4713_p10 }
  0x51   : > { %p4716_p9 = pnand %p4715_p5, %p4709_p1 }
  0x53   : > { %4719 = shalt.err (!%p4716_p9)
}
  0x54   : > { %s4720_s26 = scalar_lea.vmem %s4984_s25, 192  ;;  %s4813_s24 = smov [#allocation4]  }
  0x55   : > { %p4721_p12 = scmp.ne.s32.totalorder %s4984_s25, %s4720_s26  ;;  %s4725_s29 = sshll.u32 %s4813_s24, 4  ;;  %s4726_s29 = int_to_ptr.vmem [resolvable:$false] %s4725_s29 }
  0x56   : > { %s4727_s30 = scalar_lea.vmem %s4726_s29, 384  ;;  %p4728_p4 = scmp.lt.s32.totalorder %s4984_s25, %s4726_s29 }
  0x57   : > { %p4723_p2 = pnand %p4721_p12, %p4707_p0  ;;  %p4729_p13 = scmp.lt.s32.totalorder %s4727_s30, %s4720_s26 }
  0x59   : > { %p4724_p7 = pneg %p4723_p2  ;;  %p4730_p6 = por %p4729_p13, %p4728_p4 }
  0x5b   : > { %p4731_p10 = pnand %p4730_p6, %p4724_p7 }
  0x5d   : > { %4734 = shalt.err (!%p4731_p10)
}
  0x5e   : > { %4148 = dma.hbm_to_vmem [thread:$0]  (!%p4975_p11), %s4982_s5, 192, %s4984_s25, %s184_s7  }
  0x5f   : > { %204 = sbr.rel (%p4885_p8) target bundleno = 1853 (0x73d), region = 36  ;;  %s5014_s6 = sand.u32 (!%p4885_p8), 1, %s4797_s16  }
  0x60   : > { %s4123_s8 = smul.u32 (!%p4885_p8), 12, %s5014_s6  ;;  %s207_s9 = scalar_lea.sflag (!%p4885_p8), [#allocation5], %s5014_s6 }
  0x61   : > { %p5273_p4 = scmp.ne.s32.totalorder (!%p4885_p8), %s5266_s21, 0 }
  0x62   : > { %s5018_s10 = scalar_lea.vmem (!%p4885_p8), [#allocation4], %s4123_s8 }
  0x66   : > { %4780 = dma.done.wait (%p5273_p4), %s207_s9, 192  }
  0x67   : > { %4782 = vsyncadd (%p5273_p4), %s207_s9, 4294967104  ;;  %p5274_p7 = scmp.eq.s32.totalorder %s4866_s19, 0 }
  0x69   : > { %4784 = dma.done.wait (%p5274_p7), [#allocation8], 36864   ;;  %p5275_p8 = pmov %p5274_p7 }
  0x6a   : > { %v4202_v0 = vld [vmem:[#allocation7 + $0x4] ss:$36 sps:$4 sm:$0xff]   ;;  %v4204_v1 = vld [vmem:[#allocation7 + $0xc] ss:$36 sps:$4 sm:$0xff]   ;;  %v4210_v5 = vld [vmem:[#allocation7 + $0x54] ss:$36 sps:$4 sm:$0xff]  }
  0x6b   : > { %4786 = vsyncadd (%p5275_p8), [#allocation8], 4294930432  ;;  %1601 = vmatprep.subr.bf16.mxu0 %v4202_v0  ;;  %v4206_v2 = vld [vmem:[#allocation7] ss:$36 sps:$4 sm:$0xff]   ;;  %v4207_v3 = vld [vmem:[#allocation7 + $0x8] ss:$36 sps:$4 sm:$0xff]   ;;  %1683 = vmatprep.subr.bf16.mxu1 %v4204_v1 }
  0x6c   : > { %v4208_v4 = vld [vmem:[#allocation7 + $0x4c] ss:$36 sps:$4 sm:$0xff]   ;;  %1602 = vmatpush1.bf16.msra.mxu0 %v4206_v2  ;;  %1684 = vmatpush1.bf16.msra.mxu1 %v4207_v3  ;;  %v4214_v8 = vld [vmem:[#allocation7 + $0x94] ss:$36 sps:$4 sm:$0xff]   ;;  %v4216_v9 = vld [vmem:[#allocation7 + $0x9c] ss:$36 sps:$4 sm:$0xff]  }
  0x6d   : > { %v4212_v6 = vld [vmem:[#allocation7 + $0x48] ss:$36 sps:$4 sm:$0xff]   ;;  %1603 = vmatprep.subr.bf16.mxu0 %v4208_v4  ;;  %v4213_v7 = vld [vmem:[#allocation7 + $0x50] ss:$36 sps:$4 sm:$0xff]   ;;  %1685 = vmatprep.subr.bf16.mxu1 %v4210_v5  ;;  %v4219_v11 = vld [vmem:[#allocation7 + $0x98] ss:$36 sps:$4 sm:$0xff]  }
  0x6e   : > { %v4218_v10 = vld [vmem:[#allocation7 + $0x90] ss:$36 sps:$4 sm:$0xff]   ;;  %v4220_v12 = vld [vmem:[#allocation7 + $0xdc] ss:$36 sps:$4 sm:$0xff]   ;;  %v4222_v13 = vld [vmem:[#allocation7 + $0xe4] ss:$36 sps:$4 sm:$0xff]  }
  0x6f   : > { %v4224_v14 = vld [vmem:[#allocation7 + $0xd8] ss:$36 sps:$4 sm:$0xff]   ;;  %v4225_v15 = vld [vmem:[#allocation7 + $0xe0] ss:$36 sps:$4 sm:$0xff]   ;;  %v4228_v17 = vld [vmem:[#allocation7 + $0x12c] ss:$36 sps:$4 sm:$0xff]  }
  0x70   : > { %1604 = vmatpush1.bf16.msra.mxu0 %v4212_v6  ;;  %1686 = vmatpush1.bf16.msra.mxu1 %v4213_v7  ;;  %v4226_v16 = vld [vmem:[#allocation7 + $0x124] ss:$36 sps:$4 sm:$0xff]   ;;  %v4232_v20 = vld [vmem:[#allocation7 + $0x16c] ss:$36 sps:$4 sm:$0xff]   ;;  %v4234_v21 = vld [vmem:[#allocation7 + $0x174] ss:$36 sps:$4 sm:$0xff]  }
  0x71   : > { %1605 = vmatprep.subr.bf16.mxu0 %v4214_v8  ;;  %1687 = vmatprep.subr.bf16.mxu1 %v4216_v9  ;;  %v4230_v18 = vld [vmem:[#allocation7 + $0x120] ss:$36 sps:$4 sm:$0xff]   ;;  %v4231_v19 = vld [vmem:[#allocation7 + $0x128] ss:$36 sps:$4 sm:$0xff]   ;;  %v4237_v23 = vld [vmem:[#allocation7 + $0x170] ss:$36 sps:$4 sm:$0xff]  }
  0x72   : > { %v4236_v22 = vld [vmem:[#allocation7 + $0x168] ss:$36 sps:$4 sm:$0xff]   ;;  %v4238_v24 = vld [vmem:[#allocation7 + $0x1b4] ss:$36 sps:$4 sm:$0xff]   ;;  %v4240_v25 = vld [vmem:[#allocation7 + $0x1bc] ss:$36 sps:$4 sm:$0xff]  }
  0x73   : > { %v4242_v26 = vld [vmem:[#allocation7 + $0x1b0] ss:$36 sps:$4 sm:$0xff]   ;;  %v4243_v27 = vld [vmem:[#allocation7 + $0x1b8] ss:$36 sps:$4 sm:$0xff]   ;;  %v4246_v29 = vld [vmem:[#allocation7 + $0x204] ss:$36 sps:$4 sm:$0xff]  }
  0x74   : > { %1606 = vmatpush1.bf16.msra.mxu0 %v4218_v10  ;;  %1688 = vmatpush1.bf16.msra.mxu1 %v4219_v11  ;;  %v4244_v28 = vld [vmem:[#allocation7 + $0x1fc] ss:$36 sps:$4 sm:$0xff]   ;;  %v4250_v32 = vld [vmem:[#allocation7 + $0x244] ss:$36 sps:$4 sm:$0xff]   ;;  %v4252_v33 = vld [vmem:[#allocation7 + $0x24c] ss:$36 sps:$4 sm:$0xff]  }
  0x75   : > { %1607 = vmatprep.subr.bf16.mxu0 %v4220_v12  ;;  %1689 = vmatprep.subr.bf16.mxu1 %v4222_v13  ;;  %v4248_v30 = vld [vmem:[#allocation7 + $0x1f8] ss:$36 sps:$4 sm:$0xff]   ;;  %v4249_v31 = vld [vmem:[#allocation7 + $0x200] ss:$36 sps:$4 sm:$0xff]   ;;  %v4255_v35 = vld [vmem:[#allocation7 + $0x248] ss:$36 sps:$4 sm:$0xff]  }
  0x76   : > { %v4254_v34 = vld [vmem:[#allocation7 + $0x240] ss:$36 sps:$4 sm:$0xff]   ;;  %v4256_v36 = vld [vmem:[#allocation7 + $0x28c] ss:$36 sps:$4 sm:$0xff]   ;;  %v4258_v37 = vld [vmem:[#allocation7 + $0x294] ss:$36 sps:$4 sm:$0xff]  }
  0x77   : > { %v4260_v38 = vld [vmem:[#allocation7 + $0x288] ss:$36 sps:$4 sm:$0xff]   ;;  %v4261_v39 = vld [vmem:[#allocation7 + $0x290] ss:$36 sps:$4 sm:$0xff]   ;;  %v4264_v41 = vld [vmem:[#allocation7 + $0x2dc] ss:$36 sps:$4 sm:$0xff]  }
  0x78   : > { %1608 = vmatpush1.bf16.msra.mxu0 %v4224_v14  ;;  %1690 = vmatpush1.bf16.msra.mxu1 %v4225_v15  ;;  %v4262_v40 = vld [vmem:[#allocation7 + $0x2d4] ss:$36 sps:$4 sm:$0xff]   ;;  %v4268_v44 = vld [vmem:[#allocation7 + $0x31c] ss:$36 sps:$4 sm:$0xff]   ;;  %v4270_v45 = vld [vmem:[#allocation7 + $0x324] ss:$36 sps:$4 sm:$0xff]  }
  0x79   : > { %1609 = vmatprep.subr.bf16.mxu0 %v4226_v16  ;;  %1691 = vmatprep.subr.bf16.mxu1 %v4228_v17  ;;  %v4266_v42 = vld [vmem:[#allocation7 + $0x2d0] ss:$36 sps:$4 sm:$0xff]   ;;  %v4267_v43 = vld [vmem:[#allocation7 + $0x2d8] ss:$36 sps:$4 sm:$0xff]   ;;  %v4273_v49 = vld [vmem:[#allocation7 + $0x320] ss:$36 sps:$4 sm:$0xff]  }
  0x7a   : > { %v244_v46 = vld [vmem:[%s5018_s10] sm:$0xff]  ;;  %v4278_v52 = vld [vmem:[#allocation7 + $0x360] ss:$36 sps:$4 sm:$0xff]   ;;  %v4814_v13 = vmov 0   ;;  %vm4816_vm0 = vmmov 0   ;;  %vm2060_vm1 = vcmask 523264  }
  0x7b   : > { %v4272_v47 = vld [vmem:[#allocation7 + $0x318] ss:$36 sps:$4 sm:$0xff]   ;;  %v5029_v48 = vcombine.high %v244_v46, %v244_v46  ;;  %v4274_v50 = vld [vmem:[#allocation7 + $0x364] ss:$36 sps:$4 sm:$0xff]   ;;  %v4276_v51 = vld [vmem:[#allocation7 + $0x36c] ss:$36 sps:$4 sm:$0xff]   ;;  %v5033_v5 = vcombine.low %v244_v46, %v244_v46 }
  0x7c   : > { %1610 = vmatpush1.bf16.msra.mxu0 %v4230_v18  ;;  %1692 = vmatpush1.bf16.msra.mxu1 %v4231_v19  ;;  %v4279_v53 = vld [vmem:[#allocation7 + $0x368] ss:$36 sps:$4 sm:$0xff]   ;;  %v4282_v55 = vld [vmem:[#allocation7 + $0x3b4] ss:$36 sps:$4 sm:$0xff]   ;;  %v4288_v59 = vld [vmem:[#allocation7 + $0x3fc] ss:$36 sps:$4 sm:$0xff]  }
  0x7d   : > { %1611 = vmatprep.subr.bf16.mxu0 %v4232_v20  ;;  %1693 = vmatprep.subr.bf16.mxu1 %v4234_v21  ;;  %v4280_v54 = vld [vmem:[#allocation7 + $0x3ac] ss:$36 sps:$4 sm:$0xff]   ;;  %v4286_v58 = vld [vmem:[#allocation7 + $0x3f4] ss:$36 sps:$4 sm:$0xff]   ;;  %v4292_v62 = vld [vmem:[#allocation7 + $0x43c] ss:$36 sps:$4 sm:$0xff]  }
  0x7e   : > { %1633 = vmatprep.mubr.bf16.mxu0 %v5029_v48  ;;  %1715 = vmatprep.mubr.bf16.mxu1 %v5029_v48  ;;  %v4284_v56 = vld [vmem:[#allocation7 + $0x3a8] ss:$36 sps:$4 sm:$0xff]   ;;  %v4285_v57 = vld [vmem:[#allocation7 + $0x3b0] ss:$36 sps:$4 sm:$0xff]   ;;  %v4291_v61 = vld [vmem:[#allocation7 + $0x3f8] ss:$36 sps:$4 sm:$0xff]  }
  0x7f   : > { %v4290_v60 = vld [vmem:[#allocation7 + $0x3f0] ss:$36 sps:$4 sm:$0xff]   ;;  %v4294_v63 = vld [vmem:[#allocation7 + $0x444] ss:$36 sps:$4 sm:$0xff]   ;;  %v4296_v0 = vld [vmem:[#allocation7 + $0x438] ss:$36 sps:$4 sm:$0xff]  }
  0x80   : > { %1612 = vmatpush1.bf16.msra.mxu0 %v4236_v22  ;;  %1694 = vmatpush1.bf16.msra.mxu1 %v4237_v23  ;;  %v4297_v1 = vld [vmem:[#allocation7 + $0x440] ss:$36 sps:$4 sm:$0xff]   ;;  %v4304_v3 = vld [vmem:[#allocation7 + $0x48c] ss:$36 sps:$4 sm:$0xff]   ;;  %v4311_v8 = vld [vmem:[#allocation7 + $0x4d4] ss:$36 sps:$4 sm:$0xff]  }
  0x81   : > { %1613 = vmatprep.subr.bf16.mxu0 %v4238_v24  ;;  %1695 = vmatprep.subr.bf16.mxu1 %v4240_v25  ;;  %v4301_v2 = vld [vmem:[#allocation7 + $0x484] ss:$36 sps:$4 sm:$0xff]   ;;  %v4308_v7 = vld [vmem:[#allocation7 + $0x4cc] ss:$36 sps:$4 sm:$0xff]   ;;  %v4314_v11 = vld [vmem:[#allocation7 + $0x514] ss:$36 sps:$4 sm:$0xff]  }
  0x82   : > { %v4299_v4 = vld [vmem:[#allocation7 + $0x480] ss:$36 sps:$4 sm:$0xff]   ;;  %v4302_v6 = vld [vmem:[#allocation7 + $0x488] ss:$36 sps:$4 sm:$0xff]   ;;  %v4309_v10 = vld [vmem:[#allocation7 + $0x4d0] ss:$36 sps:$4 sm:$0xff]  }
  0x83   : > { %v4306_v9 = vld [vmem:[#allocation7 + $0x4c8] ss:$36 sps:$4 sm:$0xff]   ;;  %v4317_v12 = vld [vmem:[#allocation7 + $0x51c] ss:$36 sps:$4 sm:$0xff]   ;;  %v4312_v14 = vld [vmem:[#allocation7 + $0x510] ss:$36 sps:$4 sm:$0xff]  }
  0x84   : > { %1614 = vmatpush1.bf16.msra.mxu0 %v4242_v26  ;;  %1696 = vmatpush1.bf16.msra.mxu1 %v4243_v27  ;;  %v4315_v15 = vld [vmem:[#allocation7 + $0x518] ss:$36 sps:$4 sm:$0xff]   ;;  %v4323_v17 = vld [vmem:[#allocation7 + $0x564] ss:$36 sps:$4 sm:$0xff]   ;;  %v4329_v21 = vld [vmem:[#allocation7 + $0x5ac] ss:$36 sps:$4 sm:$0xff]  }
  0x85   : > { %1615 = vmatprep.subr.bf16.mxu0 %v4244_v28  ;;  %1697 = vmatprep.subr.bf16.mxu1 %v4246_v29  ;;  %v4320_v16 = vld [vmem:[#allocation7 + $0x55c] ss:$36 sps:$4 sm:$0xff]   ;;  %v4326_v20 = vld [vmem:[#allocation7 + $0x5a4] ss:$36 sps:$4 sm:$0xff]   ;;  %v4332_v24 = vld [vmem:[#allocation7 + $0x5ec] ss:$36 sps:$4 sm:$0xff]  }
  0x86   : > { %v4318_v18 = vld [vmem:[#allocation7 + $0x558] ss:$36 sps:$4 sm:$0xff]   ;;  %v4321_v19 = vld [vmem:[#allocation7 + $0x560] ss:$36 sps:$4 sm:$0xff]   ;;  %v4327_v23 = vld [vmem:[#allocation7 + $0x5a8] ss:$36 sps:$4 sm:$0xff]  }
  0x87   : > { %v4324_v22 = vld [vmem:[#allocation7 + $0x5a0] ss:$36 sps:$4 sm:$0xff]   ;;  %v4335_v25 = vld [vmem:[#allocation7 + $0x5f4] ss:$36 sps:$4 sm:$0xff]   ;;  %v4330_v26 = vld [vmem:[#allocation7 + $0x5e8] ss:$36 sps:$4 sm:$0xff]  }
  0x88   : > { %1616 = vmatpush1.bf16.msra.mxu0 %v4248_v30  ;;  %1698 = vmatpush1.bf16.msra.mxu1 %v4249_v31  ;;  %v4333_v27 = vld [vmem:[#allocation7 + $0x5f0] ss:$36 sps:$4 sm:$0xff]   ;;  %v4341_v29 = vld [vmem:[#allocation7 + $0x63c] ss:$36 sps:$4 sm:$0xff]   ;;  %s4817_s21 = smov 64   ;;  %vm2122_vm2 = vcmask 1043456  }
  0x89   : > { %1617 = vmatprep.subr.bf16.mxu0 %v4250_v32  ;;  %1699 = vmatprep.subr.bf16.mxu1 %v4252_v33  ;;  %v4338_v28 = vld [vmem:[#allocation7 + $0x634] ss:$36 sps:$4 sm:$0xff]   ;;  %v4344_v32 = vld [vmem:[#allocation7 + $0x67c] ss:$36 sps:$4 sm:$0xff]   ;;  %v4347_v33 = vld [vmem:[#allocation7 + $0x684] ss:$36 sps:$4 sm:$0xff]  }
  0x8a   : > { %v4336_v30 = vld [vmem:[#allocation7 + $0x630] ss:$36 sps:$4 sm:$0xff]   ;;  %v4339_v31 = vld [vmem:[#allocation7 + $0x638] ss:$36 sps:$4 sm:$0xff]   ;;  %vm2107_vm4 = vcmask 64512   ;;  %vm2168_vm5 = vcmask 519168  }
  0x8b   : > { %v4408_v46 = vld [vmem:[#allocation7 + $0xac] ss:$36 sps:$4 sm:$0xff]   ;;  %vm2299_vm6 = vcmask 1043968   ;;  %s4124_s23 = smul.u32 24, %s5014_s6  ;;  %p5276_p0 = scmp.ne.s32.totalorder %s5271_s20, 0 }
  0x8c   : > { %1618 = vmatpush1.bf16.msra.mxu0 %v4254_v34  ;;  %1700 = vmatpush1.bf16.msra.mxu1 %v4255_v35  ;;  %v4342_v34 = vld [vmem:[#allocation7 + $0x678] ss:$36 sps:$4 sm:$0xff]   ;;  %v4345_v35 = vld [vmem:[#allocation7 + $0x680] ss:$36 sps:$4 sm:$0xff]   ;;  %s4125_s25 = smul.u32 384, %s4866_s19  ;;  %s3455_s19 = scalar_lea.sflag [#allocation6], %s5014_s6 }
  0x8d   : > { %1619 = vmatprep.subr.bf16.mxu0 %v4256_v36  ;;  %1701 = vmatprep.subr.bf16.mxu1 %v4258_v37  ;;  %v4351_v36 = vld [vmem:[#allocation7 + $0x14] ss:$36 sps:$4 sm:$0xff]   ;;  %v4396_v37 = vld [vmem:[#allocation7 + $0x1c] ss:$36 sps:$4 sm:$0xff]   ;;  %s242_s7 = scalar_lea.vmem [#allocation10], %s4124_s23  ;;  %s4819_s29 = smov [#allocation10]  }
  0x8e   : > { %s3469_s12 = sshll.u32 %s242_s7, 4  ;;  %s5214_s26 = scalar_lea.hbm %s5262_s4, %s4125_s25  ;;  %s5216_s12 = int_to_ptr.vmem [resolvable:$true] %s3469_s12 }
  0x8f   : > { %s4735_s24 = scalar_lea.vmem %s5216_s12, 384  ;;  %s4739_s30 = sshll.u32 %s4819_s29, 4  ;;  %s4740_s30 = int_to_ptr.vmem [resolvable:$false] %s4739_s30 }
  0x90   : > { %1620 = vmatpush1.bf16.msra.mxu0 %v4260_v38  ;;  %1702 = vmatpush1.bf16.msra.mxu1 %v4261_v39  ;;  %v5040_v38 = vld [vmem:[%s5018_s10 + $0x8] ss:$0 sps:$4 sm:$0xff]   ;;  %p4736_p11 = scmp.ne.s32.totalorder %s5216_s12, %s4735_s24  ;;  %s4741_s8 = scalar_lea.vmem %s4740_s30, 768 }
  0x91   : > { %1621 = vmatprep.subr.bf16.mxu0 %v4262_v40  ;;  %1703 = vmatprep.subr.bf16.mxu1 %v4264_v41  ;;  %v4349_v39 = vld [vmem:[#allocation7 + $0x10] ss:$36 sps:$4 sm:$0xff]   ;;  %v4354_v40 = vld [vmem:[#allocation7 + $0x5c] ss:$36 sps:$4 sm:$0xff]   ;;  %p4742_p5 = scmp.lt.s32.totalorder %s5216_s12, %s4740_s30  ;;  %p4743_p9 = scmp.lt.s32.totalorder %s4741_s8, %s4735_s24 }
  0x92   : > { %v4394_v41 = vld [vmem:[#allocation7 + $0x18] ss:$36 sps:$4 sm:$0xff]   ;;  %p4737_p1 = pnand %p4736_p11, %p5276_p0 }
  0x93   : > { %p4744_p12 = por %p4743_p9, %p4742_p5 }
  0x94   : > { %1622 = vmatpush1.bf16.msra.mxu0 %v4266_v42  ;;  %1704 = vmatpush1.bf16.msra.mxu1 %v4267_v43  ;;  %v4402_v42 = vld [vmem:[#allocation7 + $0x64] ss:$36 sps:$4 sm:$0xff]   ;;  %v4352_v43 = vld [vmem:[#allocation7 + $0x58] ss:$36 sps:$4 sm:$0xff]   ;;  %p4738_p3 = pneg %p4737_p1 }
  0x95   : > { %1623 = vmatprep.subr.bf16.mxu0 %v4268_v44  ;;  %1705 = vmatprep.subr.bf16.mxu1 %v4270_v45  ;;  %v4357_v44 = vld [vmem:[#allocation7 + $0xa4] ss:$36 sps:$4 sm:$0xff]  }
  0x96   : > { %v4400_v45 = vld [vmem:[#allocation7 + $0x60] ss:$36 sps:$4 sm:$0xff]   ;;  %p4745_p2 = pnand %p4744_p12, %p4738_p3 }
  0x98   : > { %1624 = vmatpush1.bf16.msra.mxu0 %v4272_v47  ;;  %1706 = vmatpush1.bf16.msra.mxu1 %v4273_v49  ;;  %v4355_v47 = vld [vmem:[#allocation7 + $0xa0] ss:$36 sps:$4 sm:$0xff]   ;;  %v4360_v49 = vld [vmem:[#allocation7 + $0xec] ss:$36 sps:$4 sm:$0xff]  }
  0x99   : > { %1625 = vmatprep.subr.bf16.mxu0 %v4274_v50  ;;  %1707 = vmatprep.subr.bf16.mxu1 %v4276_v51  ;;  %v4406_v50 = vld [vmem:[#allocation7 + $0xa8] ss:$36 sps:$4 sm:$0xff]   ;;  %v4414_v51 = vld [vmem:[#allocation7 + $0xf4] ss:$36 sps:$4 sm:$0xff]  }
  0x9c   : > { %1626 = vmatpush1.bf16.msra.mxu0 %v4278_v52  ;;  %1708 = vmatpush1.bf16.msra.mxu1 %v4279_v53  ;;  %v4358_v52 = vld [vmem:[#allocation7 + $0xe8] ss:$36 sps:$4 sm:$0xff]   ;;  %v4363_v53 = vld [vmem:[#allocation7 + $0x134] ss:$36 sps:$4 sm:$0xff]  }
  0x9d   : > { %1627 = vmatprep.subr.bf16.mxu0 %v4280_v54  ;;  %1709 = vmatprep.subr.bf16.mxu1 %v4282_v55  ;;  %v4412_v54 = vld [vmem:[#allocation7 + $0xf0] ss:$36 sps:$4 sm:$0xff]   ;;  %v4420_v55 = vld [vmem:[#allocation7 + $0x13c] ss:$36 sps:$4 sm:$0xff]  }
  0xa0   : > { %1628 = vmatpush1.bf16.msra.mxu0 %v4284_v56  ;;  %1710 = vmatpush1.bf16.msra.mxu1 %v4285_v57  ;;  %v4361_v56 = vld [vmem:[#allocation7 + $0x130] ss:$36 sps:$4 sm:$0xff]   ;;  %v4366_v57 = vld [vmem:[#allocation7 + $0x17c] ss:$36 sps:$4 sm:$0xff]  }
  0xa1   : > { %1629 = vmatprep.subr.bf16.mxu0 %v4286_v58  ;;  %1711 = vmatprep.subr.bf16.mxu1 %v4288_v59  ;;  %v4418_v58 = vld [vmem:[#allocation7 + $0x138] ss:$36 sps:$4 sm:$0xff]   ;;  %v4426_v59 = vld [vmem:[#allocation7 + $0x184] ss:$36 sps:$4 sm:$0xff]  }
  0xa4   : > { %1630 = vmatpush1.bf16.msra.mxu0 %v4290_v60  ;;  %1712 = vmatpush1.bf16.msra.mxu1 %v4291_v61  ;;  %v4364_v60 = vld [vmem:[#allocation7 + $0x178] ss:$36 sps:$4 sm:$0xff]   ;;  %v4369_v61 = vld [vmem:[#allocation7 + $0x1c4] ss:$36 sps:$4 sm:$0xff]  }
  0xa5   : > { %1631 = vmatprep.subr.bf16.mxu0 %v4292_v62  ;;  %1713 = vmatprep.subr.bf16.mxu1 %v4294_v63  ;;  %v4424_v62 = vld [vmem:[#allocation7 + $0x180] ss:$36 sps:$4 sm:$0xff]   ;;  %v4432_v63 = vld [vmem:[#allocation7 + $0x1cc] ss:$36 sps:$4 sm:$0xff]  }
  0xa8   : > { %1632 = vmatpush1.bf16.msra.mxu0 %v4296_v0  ;;  %1714 = vmatpush1.bf16.msra.mxu1 %v4297_v1  ;;  %v4367_v0 = vld [vmem:[#allocation7 + $0x1c0] ss:$36 sps:$4 sm:$0xff]   ;;  %v4372_v1 = vld [vmem:[#allocation7 + $0x20c] ss:$36 sps:$4 sm:$0xff]  }
  0xa9   : > { %1642 = vmatprep.subr.bf16.mxu0 %v4301_v2  ;;  %1724 = vmatprep.subr.bf16.mxu1 %v4304_v3  ;;  %v4430_v2 = vld [vmem:[#allocation7 + $0x1c8] ss:$36 sps:$4 sm:$0xff]   ;;  %v4438_v3 = vld [vmem:[#allocation7 + $0x214] ss:$36 sps:$4 sm:$0xff]  }
  0xab   : > { %1634 = vmatmul.mubr.bf16.vlgmr.msra.gmra.mrb[0].mxu0 %v5033_v5  ;;  %1716 = vmatmul.mubr.bf16.vlgmr.msra.gmra.mrb[0].mxu1 %v5033_v5 }
  0xac   : > { %1643 = vmatpush1.bf16.msra.mxu0 %v4299_v4  ;;  %1725 = vmatpush1.bf16.msra.mxu1 %v4302_v6  ;;  %v4370_v4 = vld [vmem:[#allocation7 + $0x208] ss:$36 sps:$4 sm:$0xff]   ;;  %v4375_v6 = vld [vmem:[#allocation7 + $0x254] ss:$36 sps:$4 sm:$0xff]  }
  0xad   : > { %1644 = vmatprep.subr.bf16.mxu0 %v4308_v7  ;;  %1726 = vmatprep.subr.bf16.mxu1 %v4311_v8  ;;  %v4436_v7 = vld [vmem:[#allocation7 + $0x210] ss:$36 sps:$4 sm:$0xff]   ;;  %v4444_v8 = vld [vmem:[#allocation7 + $0x25c] ss:$36 sps:$4 sm:$0xff]  }
  0xae   : > { %1674 = vmatprep.mubr.bf16.mxu0 %v4814_v13  ;;  %1756 = vmatprep.mubr.bf16.mxu1 %v4814_v13 }
  0xb0   : > { %1645 = vmatpush1.bf16.msra.mxu0 %v4306_v9  ;;  %1727 = vmatpush1.bf16.msra.mxu1 %v4309_v10  ;;  %v4373_v9 = vld [vmem:[#allocation7 + $0x250] ss:$36 sps:$4 sm:$0xff]   ;;  %v4378_v10 = vld [vmem:[#allocation7 + $0x29c] ss:$36 sps:$4 sm:$0xff]  }
  0xb1   : > { %1646 = vmatprep.subr.bf16.mxu0 %v4314_v11  ;;  %1728 = vmatprep.subr.bf16.mxu1 %v4317_v12  ;;  %v4442_v11 = vld [vmem:[#allocation7 + $0x258] ss:$36 sps:$4 sm:$0xff]   ;;  %v4450_v12 = vld [vmem:[#allocation7 + $0x2a4] ss:$36 sps:$4 sm:$0xff]  }
  0xb4   : > { %1647 = vmatpush1.bf16.msra.mxu0 %v4312_v14  ;;  %1729 = vmatpush1.bf16.msra.mxu1 %v4315_v15  ;;  %v4376_v14 = vld [vmem:[#allocation7 + $0x298] ss:$36 sps:$4 sm:$0xff]   ;;  %v4381_v15 = vld [vmem:[#allocation7 + $0x2e4] ss:$36 sps:$4 sm:$0xff]  }
  0xb5   : > { %1648 = vmatprep.subr.bf16.mxu0 %v4320_v16  ;;  %1730 = vmatprep.subr.bf16.mxu1 %v4323_v17  ;;  %v4448_v16 = vld [vmem:[#allocation7 + $0x2a0] ss:$36 sps:$4 sm:$0xff]   ;;  %v4453_v17 = vld [vmem:[#allocation7 + $0x2ec] ss:$36 sps:$4 sm:$0xff]  }
  0xb8   : > { %1649 = vmatpush1.bf16.msra.mxu0 %v4318_v18  ;;  %1731 = vmatpush1.bf16.msra.mxu1 %v4321_v19  ;;  %v4379_v18 = vld [vmem:[#allocation7 + $0x2e0] ss:$36 sps:$4 sm:$0xff]   ;;  %v4384_v19 = vld [vmem:[#allocation7 + $0x32c] ss:$36 sps:$4 sm:$0xff]  }
  0xb9   : > { %1650 = vmatprep.subr.bf16.mxu0 %v4326_v20  ;;  %1732 = vmatprep.subr.bf16.mxu1 %v4329_v21  ;;  %v4451_v20 = vld [vmem:[#allocation7 + $0x2e8] ss:$36 sps:$4 sm:$0xff]   ;;  %v4456_v21 = vld [vmem:[#allocation7 + $0x334] ss:$36 sps:$4 sm:$0xff]  }
  0xbc   : > { %1651 = vmatpush1.bf16.msra.mxu0 %v4324_v22  ;;  %1733 = vmatpush1.bf16.msra.mxu1 %v4327_v23  ;;  %v4382_v22 = vld [vmem:[#allocation7 + $0x328] ss:$36 sps:$4 sm:$0xff]   ;;  %v4387_v23 = vld [vmem:[#allocation7 + $0x374] ss:$36 sps:$4 sm:$0xff]  }
  0xbd   : > { %1652 = vmatprep.subr.bf16.mxu0 %v4332_v24  ;;  %1734 = vmatprep.subr.bf16.mxu1 %v4335_v25  ;;  %v4454_v24 = vld [vmem:[#allocation7 + $0x330] ss:$36 sps:$4 sm:$0xff]   ;;  %v4459_v25 = vld [vmem:[#allocation7 + $0x37c] ss:$36 sps:$4 sm:$0xff]  }
  0xc0   : > { %1653 = vmatpush1.bf16.msra.mxu0 %v4330_v26  ;;  %1735 = vmatpush1.bf16.msra.mxu1 %v4333_v27  ;;  %v4385_v26 = vld [vmem:[#allocation7 + $0x370] ss:$36 sps:$4 sm:$0xff]   ;;  %v4390_v27 = vld [vmem:[#allocation7 + $0x3bc] ss:$36 sps:$4 sm:$0xff]  }
  0xc1   : > { %1654 = vmatprep.subr.bf16.mxu0 %v4338_v28  ;;  %1736 = vmatprep.subr.bf16.mxu1 %v4341_v29  ;;  %v4457_v28 = vld [vmem:[#allocation7 + $0x378] ss:$36 sps:$4 sm:$0xff]   ;;  %v4462_v29 = vld [vmem:[#allocation7 + $0x3c4] ss:$36 sps:$4 sm:$0xff]  }
  0xc4   : > { %1655 = vmatpush1.bf16.msra.mxu0 %v4336_v30  ;;  %1737 = vmatpush1.bf16.msra.mxu1 %v4339_v31  ;;  %v4388_v30 = vld [vmem:[#allocation7 + $0x3b8] ss:$36 sps:$4 sm:$0xff]   ;;  %v4460_v31 = vld [vmem:[#allocation7 + $0x3c0] ss:$36 sps:$4 sm:$0xff]  }
  0xc5   : > { %1656 = vmatprep.subr.bf16.mxu0 %v4344_v32  ;;  %1738 = vmatprep.subr.bf16.mxu1 %v4347_v33  ;;  %v4393_v32 = vld [vmem:[#allocation7 + $0x404] ss:$36 sps:$4 sm:$0xff]   ;;  %v4465_v33 = vld [vmem:[#allocation7 + $0x40c] ss:$36 sps:$4 sm:$0xff]  }
  0xc8   : > { %1657 = vmatpush1.bf16.msra.mxu0 %v4342_v34  ;;  %1739 = vmatpush1.bf16.msra.mxu1 %v4345_v35  ;;  %v4391_v34 = vld [vmem:[#allocation7 + $0x400] ss:$36 sps:$4 sm:$0xff]   ;;  %v4463_v35 = vld [vmem:[#allocation7 + $0x408] ss:$36 sps:$4 sm:$0xff]  }
  0xc9   : > { %1765 = vmatprep.subr.bf16.mxu0 %v4351_v36  ;;  %1847 = vmatprep.subr.bf16.mxu1 %v4396_v37  ;;  %v4399_v36 = vld [vmem:[#allocation7 + $0x44c] ss:$36 sps:$4 sm:$0xff]   ;;  %v4468_v37 = vld [vmem:[#allocation7 + $0x454] ss:$36 sps:$4 sm:$0xff]  }
  0xcb   : > { %1675 = vmatmul.mubr.bf16.vlgmr.msra.gmra.mrb[0].mxu0 %v5040_v38  ;;  %1757 = vmatmul.mubr.bf16.vlgmr.msra.gmra.mrb[0].mxu1 %v5040_v38 }
  0xcc   : > { %1766 = vmatpush1.bf16.msra.mxu0 %v4349_v39  ;;  %1848 = vmatpush1.bf16.msra.mxu1 %v4394_v41  ;;  %v4397_v39 = vld [vmem:[#allocation7 + $0x448] ss:$36 sps:$4 sm:$0xff]   ;;  %v4405_v41 = vld [vmem:[#allocation7 + $0x494] ss:$36 sps:$4 sm:$0xff]  }
  0xcd   : > { %1767 = vmatprep.subr.bf16.mxu0 %v4354_v40  ;;  %1849 = vmatprep.subr.bf16.mxu1 %v4402_v42  ;;  %v4466_v40 = vld [vmem:[#allocation7 + $0x450] ss:$36 sps:$4 sm:$0xff]   ;;  %v4471_v42 = vld [vmem:[#allocation7 + $0x49c] ss:$36 sps:$4 sm:$0xff]  }
  0xce   : > { %1797 = vmatprep.mubr.bf16.mxu0 %v5029_v48  ;;  %1879 = vmatprep.mubr.bf16.mxu1 %v5029_v48 }
  0xd0   : > { %1768 = vmatpush1.bf16.msra.mxu0 %v4352_v43  ;;  %1850 = vmatpush1.bf16.msra.mxu1 %v4400_v45  ;;  %v4403_v43 = vld [vmem:[#allocation7 + $0x490] ss:$36 sps:$4 sm:$0xff]   ;;  %v4469_v45 = vld [vmem:[#allocation7 + $0x498] ss:$36 sps:$4 sm:$0xff]  }
  0xd1   : > { %1769 = vmatprep.subr.bf16.mxu0 %v4357_v44  ;;  %1851 = vmatprep.subr.bf16.mxu1 %v4408_v46  ;;  %v4411_v44 = vld [vmem:[#allocation7 + $0x4dc] ss:$36 sps:$4 sm:$0xff]   ;;  %v4474_v46 = vld [vmem:[#allocation7 + $0x4e4] ss:$36 sps:$4 sm:$0xff]  }
  0xd4   : > { %1770 = vmatpush1.bf16.msra.mxu0 %v4355_v47  ;;  %1852 = vmatpush1.bf16.msra.mxu1 %v4406_v50  ;;  %v4409_v47 = vld [vmem:[#allocation7 + $0x4d8] ss:$36 sps:$4 sm:$0xff]   ;;  %v4472_v50 = vld [vmem:[#allocation7 + $0x4e0] ss:$36 sps:$4 sm:$0xff]  }
  0xd5   : > { %1771 = vmatprep.subr.bf16.mxu0 %v4360_v49  ;;  %1853 = vmatprep.subr.bf16.mxu1 %v4414_v51  ;;  %v4417_v49 = vld [vmem:[#allocation7 + $0x524] ss:$36 sps:$4 sm:$0xff]   ;;  %v4477_v51 = vld [vmem:[#allocation7 + $0x52c] ss:$36 sps:$4 sm:$0xff]  }
  0xd8   : > { %1772 = vmatpush1.bf16.msra.mxu0 %v4358_v52  ;;  %1854 = vmatpush1.bf16.msra.mxu1 %v4412_v54  ;;  %v4415_v52 = vld [vmem:[#allocation7 + $0x520] ss:$36 sps:$4 sm:$0xff]   ;;  %v4475_v54 = vld [vmem:[#allocation7 + $0x528] ss:$36 sps:$4 sm:$0xff]  }
  0xd9   : > { %1773 = vmatprep.subr.bf16.mxu0 %v4363_v53  ;;  %1855 = vmatprep.subr.bf16.mxu1 %v4420_v55  ;;  %v4423_v53 = vld [vmem:[#allocation7 + $0x56c] ss:$36 sps:$4 sm:$0xff]   ;;  %v4480_v55 = vld [vmem:[#allocation7 + $0x574] ss:$36 sps:$4 sm:$0xff]  }
  0xdc   : > { %1774 = vmatpush1.bf16.msra.mxu0 %v4361_v56  ;;  %1856 = vmatpush1.bf16.msra.mxu1 %v4418_v58  ;;  %v4421_v56 = vld [vmem:[#allocation7 + $0x568] ss:$36 sps:$4 sm:$0xff]   ;;  %v4478_v58 = vld [vmem:[#allocation7 + $0x570] ss:$36 sps:$4 sm:$0xff]  }
  0xdd   : > { %1775 = vmatprep.subr.bf16.mxu0 %v4366_v57  ;;  %1857 = vmatprep.subr.bf16.mxu1 %v4426_v59  ;;  %v4429_v57 = vld [vmem:[#allocation7 + $0x5b4] ss:$36 sps:$4 sm:$0xff]   ;;  %v4483_v59 = vld [vmem:[#allocation7 + $0x5bc] ss:$36 sps:$4 sm:$0xff]  }
  0xe0   : > { %1776 = vmatpush1.bf16.msra.mxu0 %v4364_v60  ;;  %1858 = vmatpush1.bf16.msra.mxu1 %v4424_v62  ;;  %v4427_v60 = vld [vmem:[#allocation7 + $0x5b0] ss:$36 sps:$4 sm:$0xff]   ;;  %v4481_v62 = vld [vmem:[#allocation7 + $0x5b8] ss:$36 sps:$4 sm:$0xff]  }
  0xe1   : > { %1777 = vmatprep.subr.bf16.mxu0 %v4369_v61  ;;  %1859 = vmatprep.subr.bf16.mxu1 %v4432_v63  ;;  %v4435_v61 = vld [vmem:[#allocation7 + $0x5fc] ss:$36 sps:$4 sm:$0xff]   ;;  %v4486_v63 = vld [vmem:[#allocation7 + $0x604] ss:$36 sps:$4 sm:$0xff]  }
  0xe4   : > { %1778 = vmatpush1.bf16.msra.mxu0 %v4367_v0  ;;  %1860 = vmatpush1.bf16.msra.mxu1 %v4430_v2  ;;  %v4433_v0 = vld [vmem:[#allocation7 + $0x5f8] ss:$36 sps:$4 sm:$0xff]   ;;  %v4484_v2 = vld [vmem:[#allocation7 + $0x600] ss:$36 sps:$4 sm:$0xff]  }
  0xe5   : > { %1779 = vmatprep.subr.bf16.mxu0 %v4372_v1  ;;  %1861 = vmatprep.subr.bf16.mxu1 %v4438_v3  ;;  %v4441_v1 = vld [vmem:[#allocation7 + $0x644] ss:$36 sps:$4 sm:$0xff]   ;;  %v4489_v3 = vld [vmem:[#allocation7 + $0x64c] ss:$36 sps:$4 sm:$0xff]  }
  0xe8   : > { %1780 = vmatpush1.bf16.msra.mxu0 %v4370_v4  ;;  %1862 = vmatpush1.bf16.msra.mxu1 %v4436_v7  ;;  %v4439_v4 = vld [vmem:[#allocation7 + $0x640] ss:$36 sps:$4 sm:$0xff]   ;;  %v4487_v7 = vld [vmem:[#allocation7 + $0x648] ss:$36 sps:$4 sm:$0xff]  }
  0xe9   : > { %1781 = vmatprep.subr.bf16.mxu0 %v4375_v6  ;;  %1863 = vmatprep.subr.bf16.mxu1 %v4444_v8  ;;  %v4447_v6 = vld [vmem:[#allocation7 + $0x68c] ss:$36 sps:$4 sm:$0xff]   ;;  %v4492_v8 = vld [vmem:[#allocation7 + $0x694] ss:$36 sps:$4 sm:$0xff]  }
  0xec   : > { %1782 = vmatpush1.bf16.msra.mxu0 %v4373_v9  ;;  %1864 = vmatpush1.bf16.msra.mxu1 %v4442_v11  ;;  %v4445_v9 = vld [vmem:[#allocation7 + $0x688] ss:$36 sps:$4 sm:$0xff]   ;;  %v4494_v11 = vld [vmem:[#allocation7 + $0x260] ss:$36 sps:$4 sm:$0xff]  }
  0xed   : > { %1783 = vmatprep.subr.bf16.mxu0 %v4378_v10  ;;  %1865 = vmatprep.subr.bf16.mxu1 %v4450_v12  ;;  %v4490_v10 = vld [vmem:[#allocation7 + $0x690] ss:$36 sps:$4 sm:$0xff]   ;;  %v4495_v12 = vld [vmem:[#allocation7 + $0x20] ss:$36 sps:$4 sm:$0xff]  }
  0xf0   : > { %1784 = vmatpush1.bf16.msra.mxu0 %v4376_v14  ;;  %1866 = vmatpush1.bf16.msra.mxu1 %v4448_v16  ;;  %v4493_v14 = vld [vmem:[#allocation7 + $0x4a0] ss:$36 sps:$4 sm:$0xff]   ;;  %v4815_v16 = vmov 0.0  }
  0xf1   : > { %1785 = vmatprep.subr.bf16.mxu0 %v4381_v15  ;;  %1867 = vmatprep.subr.bf16.mxu1 %v4453_v17  ;;  %v4497_v15 = vld [vmem:[#allocation7 + $0x2a8] ss:$36 sps:$4 sm:$0xff]  }
  0xf2   : > { %v4498_v17 = vld [vmem:[#allocation7 + $0x68] ss:$36 sps:$4 sm:$0xff]  }
  0xf4   : > { %1786 = vmatpush1.bf16.msra.mxu0 %v4379_v18  ;;  %1868 = vmatpush1.bf16.msra.mxu1 %v4451_v20  ;;  %v4496_v18 = vld [vmem:[#allocation7 + $0x4e8] ss:$36 sps:$4 sm:$0xff]   ;;  %v4501_v20 = vld [vmem:[#allocation7 + $0xb0] ss:$36 sps:$4 sm:$0xff]  }
  0xf5   : > { %1787 = vmatprep.subr.bf16.mxu0 %v4384_v19  ;;  %1869 = vmatprep.subr.bf16.mxu1 %v4456_v21  ;;  %v4500_v19 = vld [vmem:[#allocation7 + $0x2f0] ss:$36 sps:$4 sm:$0xff]  }
  0xf6   : > { %v4499_v21 = vld [vmem:[#allocation7 + $0x530] ss:$36 sps:$4 sm:$0xff]  }
  0xf8   : > { %1788 = vmatpush1.bf16.msra.mxu0 %v4382_v22  ;;  %1870 = vmatpush1.bf16.msra.mxu1 %v4454_v24  ;;  %v4503_v22 = vld [vmem:[#allocation7 + $0x338] ss:$36 sps:$4 sm:$0xff]  }
  0xf9   : > { %1789 = vmatprep.subr.bf16.mxu0 %v4387_v23  ;;  %1871 = vmatprep.subr.bf16.mxu1 %v4459_v25  ;;  %v4504_v23 = vld [vmem:[#allocation7 + $0xf8] ss:$36 sps:$4 sm:$0xff]   ;;  %v4506_v25 = vld [vmem:[#allocation7 + $0x380] ss:$36 sps:$4 sm:$0xff]  }
  0xfa   : > { %v4502_v24 = vld [vmem:[#allocation7 + $0x578] ss:$36 sps:$4 sm:$0xff]  }
  0xfc   : > { %1790 = vmatpush1.bf16.msra.mxu0 %v4385_v26  ;;  %1872 = vmatpush1.bf16.msra.mxu1 %v4457_v28  ;;  %v4505_v26 = vld [vmem:[#allocation7 + $0x5c0] ss:$36 sps:$4 sm:$0xff]   ;;  %v4510_v28 = vld [vmem:[#allocation7 + $0x188] ss:$36 sps:$4 sm:$0xff]  }
  0xfd   : > { %1791 = vmatprep.subr.bf16.mxu0 %v4390_v27  ;;  %1873 = vmatprep.subr.bf16.mxu1 %v4462_v29  ;;  %v4509_v27 = vld [vmem:[#allocation7 + $0x3c8] ss:$36 sps:$4 sm:$0xff]  }
  0xfe   : > { %v4508_v29 = vld [vmem:[#allocation7 + $0x608] ss:$36 sps:$4 sm:$0xff]  }
 0x100   : > { %1792 = vmatpush1.bf16.msra.mxu0 %v4388_v30  ;;  %1874 = vmatpush1.bf16.msra.mxu1 %v4460_v31  ;;  %v4512_v30 = vld [vmem:[#allocation7 + $0x410] ss:$36 sps:$4 sm:$0xff]  }
 0x101   : > { %1793 = vmatprep.subr.bf16.mxu0 %v4393_v32  ;;  %1875 = vmatprep.subr.bf16.mxu1 %v4465_v33  ;;  %v4513_v31 = vld [vmem:[#allocation7 + $0x1d0] ss:$36 sps:$4 sm:$0xff]   ;;  %v4515_v33 = vld [vmem:[#allocation7 + $0x458] ss:$36 sps:$4 sm:$0xff]  }
 0x102   : > { %v4511_v32 = vld [vmem:[#allocation7 + $0x650] ss:$36 sps:$4 sm:$0xff]  }
 0x104   : > { %1794 = vmatpush1.bf16.msra.mxu0 %v4391_v34  ;;  %1876 = vmatpush1.bf16.msra.mxu1 %v4463_v35  ;;  %v4516_v34 = vld [vmem:[#allocation7 + $0x218] ss:$36 sps:$4 sm:$0xff]  }
 0x105   : > { %1795 = vmatprep.subr.bf16.mxu0 %v4399_v36  ;;  %1877 = vmatprep.subr.bf16.mxu1 %v4468_v37  ;;  %v4514_v35 = vld [vmem:[#allocation7 + $0x698] ss:$36 sps:$4 sm:$0xff]  }
 0x108   : > { %1796 = vmatpush1.bf16.msra.mxu0 %v4397_v39  ;;  %1878 = vmatpush1.bf16.msra.mxu1 %v4466_v40 }
 0x109   : > { %1806 = vmatprep.subr.bf16.mxu0 %v4405_v41  ;;  %1888 = vmatprep.subr.bf16.mxu1 %v4471_v42 }
 0x10b   : > { %1798 = vmatmul.mubr.bf16.vlgmr.msra.gmra.mrb[4].mxu0 %v5033_v5  ;;  %1880 = vmatmul.mubr.bf16.vlgmr.msra.gmra.mrb[4].mxu1 %v5033_v5 }
 0x10c   : > { %1807 = vmatpush1.bf16.msra.mxu0 %v4403_v43  ;;  %1838 = vmatprep.mubr.bf16.mxu0 %v4814_v13 }
 0x10d   : > { %1808 = vmatprep.subr.bf16.mxu0 %v4411_v44  ;;  %1889 = vmatpush1.bf16.msra.mxu1 %v4469_v45 }
 0x10e   : > { %1890 = vmatprep.subr.bf16.mxu1 %v4474_v46  ;;  %1920 = vmatprep.mubr.bf16.mxu1 %v4814_v13 }
 0x110   : > { %1809 = vmatpush1.bf16.msra.mxu0 %v4409_v47 }
 0x111   : > { %1810 = vmatprep.subr.bf16.mxu0 %v4417_v49  ;;  %1891 = vmatpush1.bf16.msra.mxu1 %v4472_v50 }
 0x112   : > { %1892 = vmatprep.subr.bf16.mxu1 %v4477_v51 }
 0x114   : > { %1811 = vmatpush1.bf16.msra.mxu0 %v4415_v52 }
 0x115   : > { %1812 = vmatprep.subr.bf16.mxu0 %v4423_v53  ;;  %1893 = vmatpush1.bf16.msra.mxu1 %v4475_v54 }
 0x116   : > { %1894 = vmatprep.subr.bf16.mxu1 %v4480_v55 }
 0x118   : > { %1813 = vmatpush1.bf16.msra.mxu0 %v4421_v56 }
 0x119   : > { %1814 = vmatprep.subr.bf16.mxu0 %v4429_v57  ;;  %1895 = vmatpush1.bf16.msra.mxu1 %v4478_v58 }
 0x11a   : > { %1896 = vmatprep.subr.bf16.mxu1 %v4483_v59 }
 0x11c   : > { %1815 = vmatpush1.bf16.msra.mxu0 %v4427_v60 }
 0x11d   : > { %1816 = vmatprep.subr.bf16.mxu0 %v4435_v61  ;;  %1897 = vmatpush1.bf16.msra.mxu1 %v4481_v62 }
 0x11e   : > { %1898 = vmatprep.subr.bf16.mxu1 %v4486_v63 }
 0x120   : > { %1817 = vmatpush1.bf16.msra.mxu0 %v4433_v0 }
 0x121   : > { %1818 = vmatprep.subr.bf16.mxu0 %v4441_v1  ;;  %1899 = vmatpush1.bf16.msra.mxu1 %v4484_v2 }
 0x122   : > { %1900 = vmatprep.subr.bf16.mxu1 %v4489_v3 }
 0x124   : > { %1819 = vmatpush1.bf16.msra.mxu0 %v4439_v4 }
 0x125   : > { %1820 = vmatprep.subr.bf16.mxu0 %v4447_v6  ;;  %1901 = vmatpush1.bf16.msra.mxu1 %v4487_v7 }
 0x126   : > { %1902 = vmatprep.subr.bf16.mxu1 %v4492_v8 }
 0x128   : > { %1821 = vmatpush1.bf16.msra.mxu0 %v4445_v9 }
 0x129   : > { %1903 = vmatpush1.bf16.msra.mxu1 %v4490_v10  ;;  %3901 = vmatprep.subr.bf16.mxu0 %v4494_v11 }
 0x12a   : > { %3987 = vmatprep.subr.bf16.mxu1 %v4815_v16 }
 0x12b   : > { %1839 = vmatmul.mubr.bf16.vlgmr.msra.gmra.mrb[4].mxu0 %v5040_v38 }
 0x12c   : > { %1921 = vmatmul.mubr.bf16.vlgmr.msra.gmra.mrb[4].mxu1 %v5040_v38  ;;  %3902 = vmatpush3.bf16.msra.mxu0 %v4495_v12 }
 0x12d   : > { %3988 = vmatpush3.bf16.msra.mxu1 %v4493_v14  ;;  %3903 = vmatprep.subr.bf16.mxu0 %v4497_v15 }
 0x12e   : > { %3989 = vmatprep.subr.bf16.mxu1 %v4815_v16  ;;  %1961 = vmatprep.mubr.bf16.mxu0 %v5029_v48  ;;  %v4507_v48 = vld [vmem:[#allocation7 + $0x140] ss:$36 sps:$4 sm:$0xff]  }
 0x12f   : > { %4003 = vmatprep.mubr.msk.bf16.mxu1 %vm4816_vm0, %v4815_v16 }
 0x130   : > { %3904 = vmatpush3.bf16.msra.mxu0 %v4498_v17 }
 0x131   : > { %3990 = vmatpush3.bf16.msra.mxu1 %v4496_v18  ;;  %3905 = vmatprep.subr.bf16.mxu0 %v4500_v19  ;;  %v2051_v19 = vlaneseq }
 0x132   : > { %3991 = vmatprep.subr.bf16.mxu1 %v4815_v16 }
 0x134   : > { %3906 = vmatpush3.bf16.msra.mxu0 %v4501_v20 }
 0x135   : > { %3992 = vmatpush3.bf16.msra.mxu1 %v4499_v21  ;;  %3907 = vmatprep.subr.bf16.mxu0 %v4503_v22  ;;  %v5088_v21 = vshrl.u32 %v2051_v19, 7  ;;  %v2054_v22 = vand.u32 127, %v2051_v19 }
 0x136   : > { %3993 = vmatprep.subr.bf16.mxu1 %v4815_v16 }
 0x137   : > { %vm2055_vm3 = vcmp.ge.s32.totalorder %v5088_v21, %v2054_v22 }
 0x138   : > { %3908 = vmatpush3.bf16.msra.mxu0 %v4504_v23 }
 0x139   : > { %3994 = vmatpush3.bf16.msra.mxu1 %v4502_v24  ;;  %3909 = vmatprep.subr.bf16.mxu0 %v4506_v25 }
 0x13a   : > { %3995 = vmatprep.subr.bf16.mxu1 %v4815_v16 }
 0x13c   : > { %3910 = vmatpush3.bf16.msra.mxu0 %v4507_v48  ;;  %v4818_v48 = vmov -1e+30  }
 0x13d   : > { %3996 = vmatpush3.bf16.msra.mxu1 %v4505_v26  ;;  %3911 = vmatprep.subr.bf16.mxu0 %v4509_v27  ;;  %v5093_v26 = vsel %vm2055_vm3, 0.0, %v4818_v48 }
 0x13e   : > { %3997 = vmatprep.subr.bf16.mxu1 %v4815_v16 }
 0x140   : > { %3912 = vmatpush3.bf16.msra.mxu0 %v4510_v28 }
 0x141   : > { %3998 = vmatpush3.bf16.msra.mxu1 %v4508_v29  ;;  %3913 = vmatprep.subr.bf16.mxu0 %v4512_v30 }
 0x142   : > { %3999 = vmatprep.subr.bf16.mxu1 %v4815_v16 }
 0x144   : > { %3914 = vmatpush3.bf16.msra.mxu0 %v4513_v31 }
 0x145   : > { %4000 = vmatpush3.bf16.msra.mxu1 %v4511_v32  ;;  %3915 = vmatprep.subr.bf16.mxu0 %v4515_v33 }
 0x146   : > { %4001 = vmatprep.subr.bf16.mxu1 %v4815_v16 }
 0x148   : > { %3916 = vmatpush3.bf16.msra.mxu0 %v4516_v34 }
 0x149   : > { %4002 = vmatpush3.bf16.msra.mxu1 %v4514_v35  ;;  %4031 = vmatprep.subr.bf16.mxu0 %v4815_v16 }
 0x14a   : > { %4007 = vmatprep.subr.bf16.mxu1 %v4815_v16 }
 0x14b   : > { %1962 = vmatmul.mubr.bf16.vlgmr.msra.gmra.mrb[8].mxu0 %v5033_v5 }
 0x14c   : > { %4004 = vmatmul.mubr.bf16.vlgmr.msra.gmra.mrb[8].mxu1 %v5040_v38  ;;  %4033 = vmatprep.mubr.msk.bf16.mxu0 %vm4816_vm0, %v4815_v16 }
 0x14d   : > { %4009 = vmatprep.mubr.msk.bf16.mxu1 %vm4816_vm0, %v4815_v16 }
 0x19e   : > { %v1676_v36 = vpop.f32.mrb[0].mxu0  ;;  %v1758_v37 = vpop.f32.mrb[0].mxu1 }
 0x19f   : > { %v1678_v39 = vpop.f32.mrb[1].mxu0  ;;  %v1760_v40 = vpop.f32.mrb[1].mxu1 }
 0x1a0   : > { %v3893_v41 = vpack.c.bf16 %v1678_v39, %v1676_v36  ;;  %v3894_v42 = vpack.c.bf16 %v1760_v40, %v1758_v37  ;;  %v1680_v43 = vpop.f32.mrb[2].mxu0  ;;  %v1762_v44 = vpop.f32.mrb[2].mxu1 }
 0x1a1   : > { %v1681_v45 = vpop.f32.mrb[3].mxu0  ;;  %v1763_v46 = vpop.f32.mrb[3].mxu1 }
 0x1a2   : > { %2046 = vst [vmem:[#allocation2] sm:$0xff] %v3893_v41  ;;  %2047 = vst [vmem:[#allocation2 + $0x8] sm:$0xff] %v3894_v42 }
 0x1a9   : > { %v2058_v5 = vld [vmem:[#allocation2 + $0xc] sm:$0xf]  ;;  %v4517_v38 = vld [vmem:[#allocation2] ss:$0 sps:$4 sm:$0xff]   ;;  %v4519_v1 = vld [vmem:[#allocation2 + $0x4] ss:$0 sps:$4 sm:$0xff]  }
 0x1aa   : > { %v2065_v47 = vsel %vm2060_vm1, %v2058_v5, 0  ;;  %2176 = vrot.lane.b32.xlu1 %v4517_v38, %s4817_s21  ;;  %v2057_v49 = vld [vmem:[#allocation2] sm:$0xf]  ;;  %v2301_v3 = vld [vmem:[#allocation2 + $0x4] sm:$0xf] }
 0x1ab   : > { %4008 = vmatpush3.bf16.xpose.msra.mxu1 %v2065_v47  ;;  %v4521_v4 = vld [vmem:[#allocation2 + $0x8] ss:$0 sps:$4 sm:$0xff]   ;;  %v4522_v40 = vld [vmem:[#allocation2 + $0xc] ss:$0 sps:$4 sm:$0xff]  }
 0x1ac   : > { %4013 = vmatprep.subr.bf16.mxu1 %v4815_v16  ;;  %v2540_v37 = vld [vmem:[#allocation2 + $0x8] sm:$0xf] }
 0x1b2   : > { %4010 = vmatmul.mubr.msk.bf16.vlgmr.msra.gmra.mrb[12].mxu1 %vm2060_vm1, %v2057_v49 }
 0x1b3   : > { %4015 = vmatprep.mubr.msk.bf16.mxu1 %vm4816_vm0, %v4815_v16 }
 0x1fe   : > { %v1840_v50 = vpop.f32.mrb[4].mxu0 }
 0x1ff   : > { %v1842_v51 = vpop.f32.mrb[5].mxu0  ;;  %v1922_v52 = vpop.f32.mrb[4].mxu1 }
 0x200   : > { %v3895_v53 = vpack.c.bf16 %v1842_v51, %v1840_v50  ;;  %v1924_v54 = vpop.f32.mrb[5].mxu1  ;;  %v1844_v55 = vpop.f32.mrb[6].mxu0 }
 0x201   : > { %v3896_v56 = vpack.c.bf16 %v1924_v54, %v1922_v52  ;;  %v1926_v57 = vpop.f32.mrb[6].mxu1  ;;  %v1845_v58 = vpop.f32.mrb[7].mxu0 }
 0x202   : > { %2048 = vst [vmem:[#allocation2 + $0x10] sm:$0xff] %v3895_v53  ;;  %v1927_v59 = vpop.f32.mrb[7].mxu1 }
 0x203   : > { %2049 = vst [vmem:[#allocation2 + $0x18] sm:$0xff] %v3896_v56 }
 0x209   : > { %v2302_v60 = vld [vmem:[#allocation2 + $0x10] sm:$0xf]  ;;  %v4520_v2 = vld [vmem:[#allocation2 + $0x14] ss:$0 sps:$4 sm:$0xff]  }
 0x20a   : > { %v4518_v61 = vld [vmem:[#allocation2 + $0x10] ss:$0 sps:$4 sm:$0xff]   ;;  %v2308_v62 = vsel %vm2060_vm1, %v2302_v60, 0  ;;  %v2059_v63 = vld [vmem:[#allocation2 + $0x18] sm:$0xf] }
 0x20b   : > { %4032 = vmatpush3.bf16.xpose.msra.mxu0 %v2308_v62  ;;  %2421 = vrot.lane.b32.xlu1 %v4518_v61, %s4817_s21  ;;  %v2124_v0 = vsel %vm2122_vm2, %v2059_v63, 0  ;;  %v2541_v25 = vld [vmem:[#allocation2 + $0x14] sm:$0xf]  ;;  %v4523_v5 = vld [vmem:[#allocation2 + $0x18] ss:$0 sps:$4 sm:$0xff]  }
 0x20c   : > { %4043 = vmatprep.subr.bf16.mxu0 %v4815_v16  ;;  %4014 = vmatpush3.bf16.msra.mxu1 %v2124_v0  ;;  %v2547_v27 = vsel %vm2060_vm1, %v2541_v25, 0  ;;  %v4524_v25 = vld [vmem:[#allocation2 + $0x1c] ss:$0 sps:$4 sm:$0xff]  }
 0x20d   : > { %4019 = vmatprep.subr.bf16.mxu1 %v4815_v16 }
 0x20f   : > { %2416 = vrot.lane.b32.xlu1 %v4519_v1, %s4817_s21 }
 0x212   : > { %4034 = vmatmul.mubr.msk.bf16.vlgmr.msra.gmra.mrb[12].mxu0 %vm2060_vm1, %v2301_v3 }
 0x213   : > { %2660 = vrot.lane.b32.xlu1 %v4520_v2, %s4817_s21  ;;  %4045 = vmatprep.mubr.msk.bf16.mxu0 %vm4816_vm0, %v4815_v16 }
 0x217   : > { %2655 = vrot.lane.b32.xlu1 %v4521_v4, %s4817_s21 }
 0x21c   : > { %v2177_v20 = vpop.permute.xlu1 %2176 }
 0x21e   : > { %v3917_v6 = vpop.f32.mrb[8].mxu0 }
 0x21f   : > { %v2003_v7 = vpop.f32.mrb[8].mxu1  ;;  %v3918_v8 = vpop.f32.mrb[9].mxu0 }
 0x220   : > { %v3919_v9 = vadd.f32 %v3918_v8, %v3917_v6  ;;  %v4005_v10 = vpop.f32.mrb[9].mxu1  ;;  %v3920_v11 = vpop.f32.mrb[10].mxu0 }
 0x221   : > { %v2006_v12 = vpop.f32.mrb[10].mxu1  ;;  %v3921_v14 = vpop.f32.mrb[11].mxu0 }
 0x222   : > { %v2004_v15 = vadd.f32 %v3919_v9, %v2003_v7  ;;  %v4006_v17 = vpop.f32.mrb[11].mxu1 }
 0x224   : > { %v3897_v18 = vpack.c.bf16 %v2004_v15, %v2004_v15 }
 0x226   : > { %2050 = vst [vmem:[#allocation2 + $0x20] sm:$0xf] %v3897_v18 }
 0x22d   : > { %v4525_v48 = vld [vmem:[#allocation2 + $0x20] ss:$0 sps:$4 sm:$0xff]  }
 0x27d   : > { %v2422_v23 = vpop.permute.xlu1 %2421 }
 0x27e   : > { %v2427_v24 = vsel %vm2060_vm1, %v2422_v23, 0 }
 0x27f   : > { %4044 = vmatpush3.bf16.xpose.msra.mxu0 %v2427_v24 }
 0x280   : > { %4055 = vmatprep.subr.bf16.mxu0 %v4815_v16 }
 0x281   : > { %v2417_v28 = vpop.permute.xlu1 %2416 }
 0x285   : > { %v2101_v29 = vpop.f32.mrb[12].mxu1  ;;  %v2661_v35 = vpop.permute.xlu1 %2660 }
 0x286   : > { %v2102_v30 = vadd.f32 %v2101_v29, %v5093_v26  ;;  %v4011_v31 = vpop.f32.mrb[13].mxu1  ;;  %4046 = vmatmul.mubr.msk.bf16.vlgmr.msra.gmra.mrb[16].mxu0 %vm2060_vm1, %v2417_v28  ;;  %v2666_v36 = vsel %vm2060_vm1, %v2661_v35, 0 }
 0x287   : > { %v2104_v32 = vpop.f32.mrb[14].mxu1  ;;  %4056 = vmatpush3.bf16.xpose.msra.mxu0 %v2547_v27  ;;  %4057 = vmatprep.mubr.msk.bf16.mxu0 %vm4816_vm0, %v4815_v16 }
 0x288   : > { %v4012_v33 = vpop.f32.mrb[15].mxu1  ;;  %v2108_v34 = vsel %vm2107_vm4, %v2102_v30, -inf  ;;  %4067 = vmatprep.subr.bf16.mxu0 %v4815_v16 }
 0x289   : > { %2109 = vmax.xlane.f32.xlu0 %v2108_v34  ;;  %v2656_v39 = vpop.permute.xlu1 %2655 }
 0x28e   : > { %4058 = vmatmul.mubr.msk.bf16.vlgmr.msra.gmra.mrb[20].mxu0 %vm2060_vm1, %v2540_v37 }
 0x28f   : > { %4068 = vmatpush3.bf16.xpose.msra.mxu0 %v2666_v36  ;;  %4069 = vmatprep.mubr.msk.bf16.mxu0 %vm4816_vm0, %v4815_v16 }
 0x296   : > { %4070 = vmatmul.mubr.msk.bf16.vlgmr.msra.gmra.mrb[24].mxu0 %vm2060_vm1, %v2656_v39  ;;  %v2303_v39 = vld [vmem:[#allocation2 + $0x1c] sm:$0xf] }
 0x29f   : > { %2181 = vrot.lane.b32.xlu0 %v4522_v40, %s4817_s21 }
 0x2e5   : > { %v2344_v41 = vpop.f32.mrb[12].mxu0 }
 0x2e6   : > { %v5109_v42 = vadd.f32 %v2344_v41, %v5093_v26  ;;  %v4035_v43 = vpop.f32.mrb[13].mxu0 }
 0x2e7   : > { %v2347_v44 = vpop.f32.mrb[14].mxu0 }
 0x2e8   : > { %v4036_v45 = vpop.f32.mrb[15].mxu0  ;;  %v2350_v46 = vsel %vm2107_vm4, %v5109_v42, -inf  ;;  %v2365_v44 = vsel %vm2122_vm2, %v2303_v39, 0  ;;  %v4564_v39 = vld [vmem:[#allocation9 + $0x38] ss:$12 sps:$4 sm:$0xff]  }
 0x2e9   : > { %2351 = vmax.xlane.f32.xlu0 %v2350_v46 }
 0x2ff   : > { %2243 = vrot.lane.b32.xlu0 %v4523_v5, %s4817_s21 }
 0x316   : > { %v2110_v38 = vpop.xlane.xlu0 %2109 }
 0x317   : > { %v2111_v47 = vsub.f32 %v2102_v30, %v2110_v38 }
 0x319   : > { %v2112_v49 = vmul.f32 1.442695, %v2111_v47 }
 0x31a   : > { %v2182_v51 = vpop.permute.xlu0 %2181 }
 0x31b   : > { %4625 = vpow2.f32 %v2112_v49  ;;  %v2187_v53 = vsel %vm2060_vm1, %v2182_v51, 0 }
 0x325   : > { %v5114_v50 = vpop.eup %4625 }
 0x326   : > { %v2118_v52 = vpack.c.bf16 %v5114_v50, %v5114_v50 }
 0x328   : > { %4016 = vmatmul.mubr.msk.bf16.vlgmr.msra.gmra.mrb[16].mxu1 %vm2107_vm4, %v2118_v52 }
 0x329   : > { %4020 = vmatpush3.bf16.xpose.msra.mxu1 %v2187_v53  ;;  %4021 = vmatprep.mubr.msk.bf16.mxu1 %vm4816_vm0, %v4815_v16 }
 0x32a   : > { %4025 = vmatprep.subr.bf16.mxu1 %v4815_v16 }
 0x330   : > { %4022 = vmatmul.mubr.msk.bf16.vlgmr.msra.gmra.mrb[20].mxu1 %vm2060_vm1, %v2177_v20 }
 0x331   : > { %4027 = vmatprep.mubr.msk.bf16.mxu1 %vm4816_vm0, %v4815_v16 }
 0x359   : > { %v2463_v54 = vpop.f32.mrb[16].mxu0 }
 0x35a   : > { %v4047_v55 = vpop.f32.mrb[17].mxu0  ;;  %v2464_v18 = vadd.f32 %v2463_v54, %v5093_v26 }
 0x35b   : > { %v2466_v56 = vpop.f32.mrb[18].mxu0  ;;  %v2114_v55 = vsel %vm2107_vm4, %v5114_v50, 0.0 }
 0x35c   : > { %v4048_v57 = vpop.f32.mrb[19].mxu0  ;;  %v2469_v23 = vsel %vm2107_vm4, %v2464_v18, -inf  ;;  %v2542_v56 = vld [vmem:[#allocation2 + $0x20] sm:$0xf] }
 0x361   : > { %v2583_v58 = vpop.f32.mrb[20].mxu0 }
 0x362   : > { %v4059_v59 = vpop.f32.mrb[21].mxu0  ;;  %v2584_v22 = vadd.f32 %v2583_v58, %v5093_v26  ;;  %v2604_v58 = vsel %vm2122_vm2, %v2542_v56, 0 }
 0x363   : > { %v2586_v60 = vpop.f32.mrb[22].mxu0 }
 0x364   : > { %v4060_v61 = vpop.f32.mrb[23].mxu0  ;;  %v2589_v24 = vsel %vm2107_vm4, %v2584_v22, -inf }
 0x369   : > { %v2702_v62 = vpop.f32.mrb[24].mxu0 }
 0x36a   : > { %v2703_v63 = vadd.f32 %v2702_v62, %v5093_v26  ;;  %v4071_v0 = vpop.f32.mrb[25].mxu0 }
 0x36b   : > { %v2705_v1 = vpop.f32.mrb[26].mxu0  ;;  %v4528_v0 = vld [vmem:[#allocation9 + $0x4] ss:$12 sps:$4 sm:$0xff]  }
 0x36c   : > { %v4072_v2 = vpop.f32.mrb[27].mxu0  ;;  %v2708_v3 = vsel %vm2107_vm4, %v2703_v63, -inf  ;;  %v4531_v1 = vld [vmem:[#allocation9 + $0x1c] ss:$12 sps:$4 sm:$0xff]   ;;  %3289 = vmatprep.subr.bf16.mxu0 %v4528_v0 }
 0x36d   : > { %2709 = vmax.xlane.f32.xlu0 %v2708_v3  ;;  %v4529_v2 = vld [vmem:[#allocation9 + $0x18] ss:$12 sps:$4 sm:$0xff]  }
 0x376   : > { %v2352_v4 = vpop.xlane.xlu0 %2351 }
 0x377   : > { %v2353_v27 = vsub.f32 %v5109_v42, %v2352_v4  ;;  %v4534_v4 = vld [vmem:[#allocation9 + $0x34] ss:$12 sps:$4 sm:$0xff]  }
 0x379   : > { %v2354_v31 = vmul.f32 1.442695, %v2353_v27  ;;  %v4547_v27 = vld [vmem:[#allocation9 + $0xa8] ss:$12 sps:$4 sm:$0xff]  }
 0x37a   : > { %v2244_v6 = vpop.permute.xlu0 %2243 }
 0x37b   : > { %v2249_v7 = vsel %vm2122_vm2, %v2244_v6, 0  ;;  %v4553_v6 = vld [vmem:[#allocation9 + $0xc8] ss:$12 sps:$4 sm:$0xff]  }
 0x37c   : > { %4026 = vmatpush3.bf16.msra.mxu1 %v2249_v7  ;;  %v4554_v7 = vld [vmem:[#allocation9 + $0x8] ss:$12 sps:$4 sm:$0xff]  }
 0x37d   : > { %4037 = vmatprep.subr.bf16.mxu1 %v4815_v16 }
 0x3fa   : > { %v2710_v28 = vpop.xlane.xlu0 %2709 }
 0x3fb   : > { %v5130_v8 = vpop.f32.mrb[16].mxu1  ;;  %v2711_v32 = vsub.f32 %v2703_v63, %v2710_v28  ;;  %v4526_v63 = vld [vmem:[#allocation9] ss:$12 sps:$4 sm:$0xff]   ;;  %v4552_v28 = vld [vmem:[#allocation9 + $0xc4] ss:$12 sps:$4 sm:$0xff]  }
 0x3fc   : > { %v4017_v9 = vpop.f32.mrb[17].mxu1  ;;  %3290 = vmatpush1.bf16.msra.mxu0 %v4526_v63  ;;  %v4582_v63 = vld [vmem:[#allocation9 + $0x154] ss:$12 sps:$4 sm:$0xff]  }
 0x3fd   : > { %v2163_v10 = vpop.f32.mrb[18].mxu1  ;;  %v2712_v35 = vmul.f32 1.442695, %v2711_v32  ;;  %3291 = vmatprep.subr.bf16.mxu0 %v4531_v1  ;;  %v4532_v9 = vld [vmem:[#allocation9 + $0x30] ss:$12 sps:$4 sm:$0xff]  }
 0x3fe   : > { %v4018_v11 = vpop.f32.mrb[19].mxu1  ;;  %v4583_v1 = vld [vmem:[#allocation9 + $0x158] ss:$12 sps:$4 sm:$0xff]  }
 0x3ff   : > { %v4537_v11 = vld [vmem:[#allocation9 + $0x4c] ss:$12 sps:$4 sm:$0xff]  }
 0x400   : > { %3292 = vmatpush1.bf16.msra.mxu0 %v4529_v2 }
 0x401   : > { %3293 = vmatprep.subr.bf16.mxu0 %v4534_v4 }
 0x403   : > { %v2223_v12 = vpop.f32.mrb[20].mxu1 }
 0x404   : > { %v2224_v14 = vadd.f32 %v2223_v12, %v5093_v26  ;;  %v4023_v15 = vpop.f32.mrb[21].mxu1  ;;  %3294 = vmatpush1.bf16.msra.mxu0 %v4532_v9  ;;  %v4535_v12 = vld [vmem:[#allocation9 + $0x48] ss:$12 sps:$4 sm:$0xff]   ;;  %v4588_v9 = vld [vmem:[#allocation9 + $0x170] ss:$12 sps:$4 sm:$0xff]  }
 0x405   : > { %v2226_v17 = vpop.f32.mrb[22].mxu1  ;;  %3295 = vmatprep.subr.bf16.mxu0 %v4537_v11  ;;  %v4540_v15 = vld [vmem:[#allocation9 + $0x64] ss:$12 sps:$4 sm:$0xff]  }
 0x406   : > { %v4024_v19 = vpop.f32.mrb[23].mxu1  ;;  %v2229_v20 = vsel %vm2107_vm4, %v2224_v14, -inf  ;;  %v4538_v17 = vld [vmem:[#allocation9 + $0x60] ss:$12 sps:$4 sm:$0xff]   ;;  %v4589_v11 = vld [vmem:[#allocation9 + $0xb0] ss:$12 sps:$4 sm:$0xff]  }
 0x407   : > { %2230 = vmax.xlane.f32.xlu1 %v2229_v20  ;;  %v4541_v19 = vld [vmem:[#allocation9 + $0x78] ss:$12 sps:$4 sm:$0xff]   ;;  %v4546_v20 = vld [vmem:[#allocation9 + $0x94] ss:$12 sps:$4 sm:$0xff]  }
 0x408   : > { %3296 = vmatpush1.bf16.msra.mxu0 %v4535_v12 }
 0x409   : > { %3297 = vmatprep.subr.bf16.mxu0 %v4540_v15 }
 0x40b   : > { %2470 = vmax.xlane.f32.xlu1 %v2469_v23  ;;  %v4544_v23 = vld [vmem:[#allocation9 + $0x90] ss:$12 sps:$4 sm:$0xff]  }
 0x40c   : > { %3298 = vmatpush1.bf16.msra.mxu0 %v4538_v17 }
 0x40f   : > { %2590 = vmax.xlane.f32.xlu1 %v2589_v24 }
 0x420   : > { %2483 = vrot.lane.b32.xlu1 %v4524_v25, %s4817_s21  ;;  %v4549_v25 = vld [vmem:[#allocation9 + $0xac] ss:$12 sps:$4 sm:$0xff]  }
 0x424   : > { %2722 = vrot.lane.b32.xlu1 %v4525_v48, %s4817_s21 }
 0x494   : > { %v2231_v29 = vpop.xlane.xlu1 %2230 }
 0x495   : > { %v2232_v30 = vsub.f32 %v2224_v14, %v2231_v29  ;;  %v4550_v29 = vld [vmem:[#allocation9 + $0xc0] ss:$12 sps:$4 sm:$0xff]  }
 0x497   : > { %v2233_v26 = vmul.f32 1.442695, %v2232_v30  ;;  %v4557_v30 = vld [vmem:[#allocation9 + $0xdc] ss:$12 sps:$4 sm:$0xff]  }
 0x498   : > { %v2471_v33 = vpop.xlane.xlu1 %2470 }
 0x499   : > { %4627 = vpow2.f32 %v2233_v26  ;;  %v2472_v34 = vsub.f32 %v2464_v18, %v2471_v33  ;;  %v4543_v18 = vld [vmem:[#allocation9 + $0x7c] ss:$12 sps:$4 sm:$0xff]   ;;  %v4559_v26 = vld [vmem:[#allocation9 + $0x20] ss:$12 sps:$4 sm:$0xff]  }
 0x49a   : > { %4629 = vpow2.f32 %v2354_v31  ;;  %3299 = vmatprep.subr.bf16.mxu0 %v4543_v18  ;;  %v4555_v31 = vld [vmem:[#allocation9 + $0xd8] ss:$12 sps:$4 sm:$0xff]   ;;  %v4560_v33 = vld [vmem:[#allocation9 + $0xf0] ss:$12 sps:$4 sm:$0xff]  }
 0x49b   : > { %v2473_v36 = vmul.f32 1.442695, %v2472_v34  ;;  %3300 = vmatpush1.bf16.msra.mxu0 %v4541_v19  ;;  %v4562_v34 = vld [vmem:[#allocation9 + $0xf4] ss:$12 sps:$4 sm:$0xff]  }
 0x49c   : > { %v2591_v40 = vpop.xlane.xlu1 %2590  ;;  %3301 = vmatprep.subr.bf16.mxu0 %v4546_v20 }
 0x49d   : > { %4631 = vpow2.f32 %v2473_v36  ;;  %v2592_v46 = vsub.f32 %v2584_v22, %v2591_v40  ;;  %v4567_v36 = vld [vmem:[#allocation9 + $0x10c] ss:$12 sps:$4 sm:$0xff]   ;;  %v4565_v40 = vld [vmem:[#allocation9 + $0x108] ss:$12 sps:$4 sm:$0xff]  }
 0x49e   : > { %4633 = vpow2.f32 %v2712_v35  ;;  %v4563_v35 = vld [vmem:[#allocation9 + $0xf8] ss:$12 sps:$4 sm:$0xff]  }
 0x49f   : > { %v2593_v49 = vmul.f32 1.442695, %v2592_v46  ;;  %3302 = vmatpush1.bf16.msra.mxu0 %v4544_v23  ;;  %v4570_v46 = vld [vmem:[#allocation9 + $0x120] ss:$12 sps:$4 sm:$0xff]  }
 0x4a0   : > { %v2484_v51 = vpop.permute.xlu1 %2483  ;;  %3303 = vmatprep.subr.bf16.mxu0 %v4549_v25 }
 0x4a1   : > { %v2489_v54 = vsel %vm2122_vm2, %v2484_v51, 0  ;;  %4635 = vpow2.f32 %v2593_v49  ;;  %v4577_v49 = vld [vmem:[#allocation9 + $0x13c] ss:$12 sps:$4 sm:$0xff]  }
 0x4a3   : > { %v4628_v37 = vpop.eup %4627  ;;  %3304 = vmatpush1.bf16.msra.mxu0 %v4547_v27 }
 0x4a4   : > { %v2235_v41 = vsel %vm2107_vm4, %v4628_v37, 0.0  ;;  %v2239_v42 = vpack.c.bf16 %v4628_v37, %v4628_v37  ;;  %v4630_v43 = vpop.eup %4629  ;;  %v2723_v60 = vpop.permute.xlu1 %2722  ;;  %3305 = vmatprep.subr.bf16.mxu0 %v4552_v28 }
 0x4a5   : > { %2236 = vadd.xlane.f32.xlu1 %v2235_v41  ;;  %v2356_v38 = vsel %vm2107_vm4, %v4630_v43, 0.0  ;;  %v2360_v53 = vpack.c.bf16 %v4630_v43, %v4630_v43  ;;  %v2728_v61 = vsel %vm2122_vm2, %v2723_v60, 0  ;;  %v4568_v41 = vld [vmem:[#allocation9 + $0x110] ss:$12 sps:$4 sm:$0xff]   ;;  %v4579_v60 = vld [vmem:[#allocation9 + $0x80] ss:$12 sps:$4 sm:$0xff]  }
 0x4a6   : > { %4028 = vmatmul.mubr.msk.bf16.vlgmr.msra.gmra.mrb[24].mxu1 %vm2107_vm4, %v2239_v42  ;;  %v4572_v42 = vld [vmem:[#allocation9 + $0x124] ss:$12 sps:$4 sm:$0xff]  }
 0x4a7   : > { %v4632_v45 = vpop.eup %4631  ;;  %4038 = vmatpush3.bf16.msra.mxu1 %v2365_v44  ;;  %4039 = vmatprep.mubr.msk.bf16.mxu1 %vm4816_vm0, %v4815_v16  ;;  %v4569_v43 = vld [vmem:[#allocation9 + $0x50] ss:$12 sps:$4 sm:$0xff]  }
 0x4a8   : > { %v2475_v5 = vsel %vm2107_vm4, %v4632_v45, 0.0  ;;  %4049 = vmatprep.subr.bf16.mxu1 %v4815_v16  ;;  %v4634_v47 = vpop.eup %4633  ;;  %v2479_v57 = vpack.c.bf16 %v4632_v45, %v4632_v45  ;;  %3306 = vmatpush1.bf16.msra.mxu0 %v4550_v29 }
 0x4a9   : > { %2476 = vadd.xlane.f32.xlu0 %v2475_v5  ;;  %2357 = vadd.xlane.f32.xlu1 %v2356_v38  ;;  %v2714_v52 = vsel %vm2107_vm4, %v4634_v47, 0.0  ;;  %v2718_v62 = vpack.c.bf16 %v4634_v47, %v4634_v47  ;;  %v4573_v5 = vld [vmem:[#allocation9 + $0x128] ss:$12 sps:$4 sm:$0xff]  }
 0x4aa   : > { %3307 = vmatprep.subr.bf16.mxu0 %v4557_v30 }
 0x4ab   : > { %v5162_v59 = vpop.eup %4635 }
 0x4ac   : > { %v2599_v50 = vpack.c.bf16 %v5162_v59, %v5162_v59  ;;  %3308 = vmatpush1.bf16.msra.mxu0 %v4555_v31 }
 0x4ad   : > { %2715 = vadd.xlane.f32.xlu0 %v2714_v52  ;;  %3309 = vmatprep.subr.bf16.mxu0 %v4562_v34 }
 0x4ae   : > { %4040 = vmatmul.mubr.msk.bf16.vlgmr.msra.gmra.mrb[28].mxu1 %vm2107_vm4, %v2360_v53 }
 0x4af   : > { %4050 = vmatpush3.bf16.msra.mxu1 %v2489_v54  ;;  %4051 = vmatprep.mubr.msk.bf16.mxu1 %vm4816_vm0, %v4815_v16  ;;  %v4574_v54 = vld [vmem:[#allocation9 + $0x68] ss:$12 sps:$4 sm:$0xff]  }
 0x4b0   : > { %4061 = vmatprep.subr.bf16.mxu1 %v4815_v16  ;;  %3310 = vmatpush1.bf16.msra.mxu0 %v4560_v33 }
 0x4b1   : > { %2115 = vadd.xlane.f32.xlu0 %v2114_v55  ;;  %3311 = vmatprep.subr.bf16.mxu0 %v4567_v36  ;;  %v4575_v55 = vld [vmem:[#allocation9 + $0x138] ss:$12 sps:$4 sm:$0xff]  }
 0x4b4   : > { %3312 = vmatpush1.bf16.msra.mxu0 %v4565_v40  ;;  %v4598_v40 = vld [vmem:[#allocation9 + $0x19c] ss:$12 sps:$4 sm:$0xff]  }
 0x4b5   : > { %3313 = vmatprep.subr.bf16.mxu0 %v4572_v42  ;;  %v4602_v42 = vld [vmem:[#allocation9 + $0x1b4] ss:$12 sps:$4 sm:$0xff]  }
 0x4b6   : > { %4052 = vmatmul.mubr.msk.bf16.vlgmr.msra.gmra.mrb[32].mxu1 %vm2107_vm4, %v2479_v57 }
 0x4b7   : > { %4062 = vmatpush3.bf16.msra.mxu1 %v2604_v58  ;;  %4063 = vmatprep.mubr.msk.bf16.mxu1 %vm4816_vm0, %v4815_v16  ;;  %v4578_v58 = vld [vmem:[#allocation9 + $0x140] ss:$12 sps:$4 sm:$0xff]  }
 0x4b8   : > { %4073 = vmatprep.subr.bf16.mxu1 %v4815_v16  ;;  %3314 = vmatpush1.bf16.msra.mxu0 %v4570_v46  ;;  %v4604_v46 = vld [vmem:[#allocation9 + $0x1c8] ss:$12 sps:$4 sm:$0xff]  }
 0x4b9   : > { %3315 = vmatprep.subr.bf16.mxu0 %v4577_v49  ;;  %v4614_v49 = vld [vmem:[#allocation9 + $0x1fc] ss:$12 sps:$4 sm:$0xff]  }
 0x4bc   : > { %3316 = vmatpush1.bf16.msra.mxu0 %v4575_v55  ;;  %v4619_v55 = vld [vmem:[#allocation9 + $0x218] ss:$12 sps:$4 sm:$0xff]  }
 0x4bd   : > { %3317 = vmatprep.subr.bf16.mxu0 %v4582_v63 }
 0x4be   : > { %4064 = vmatmul.mubr.msk.bf16.vlgmr.msra.gmra.mrb[36].mxu1 %vm2107_vm4, %v2599_v50 }
 0x4bf   : > { %4074 = vmatpush3.bf16.msra.mxu1 %v2728_v61  ;;  %4075 = vmatprep.mubr.msk.bf16.mxu1 %vm4816_vm0, %v4815_v16 }
 0x4c0   : > { %3956 = vmatprep.subr.bf16.mxu1 %v4553_v6  ;;  %v4584_v6 = vld [vmem:[#allocation9 + $0x98] ss:$12 sps:$4 sm:$0xff]  }
 0x4c6   : > { %4076 = vmatmul.mubr.msk.bf16.vlgmr.msra.gmra.mrb[40].mxu1 %vm2107_vm4, %v2718_v62  ;;  %v4580_v62 = vld [vmem:[#allocation9 + $0x150] ss:$12 sps:$4 sm:$0xff]  }
 0x4c7   : > { %3957 = vmatpush3.bf16.msra.mxu1 %v4554_v7  ;;  %v4587_v7 = vld [vmem:[#allocation9 + $0x16c] ss:$12 sps:$4 sm:$0xff]   ;;  %3318 = vmatpush1.bf16.msra.mxu0 %v4580_v62 }
 0x4c8   : > { %3319 = vmatprep.subr.bf16.mxu0 %v4587_v7  ;;  %v2889_v7 = vsub.s32 2, %v5088_v21 }
 0x532   : > { %v2237_v32 = vpop.xlane.xlu1 %2236 }
 0x536   : > { %v5171_v3 = vpop.xlane.xlu0 %2476  ;;  %v2358_v37 = vpop.xlane.xlu1 %2357 }
 0x53a   : > { %v5173_v10 = vpop.xlane.xlu0 %2715 }
 0x53e   : > { %v2116_v14 = vpop.xlane.xlu0 %2115 }
 0x53f   : > { %4637 = vrcp.f32 %v2116_v14 }
 0x540   : > { %4639 = vrcp.f32 %v2237_v32 }
 0x541   : > { %4641 = vrcp.f32 %v2358_v37  ;;  %v4592_v37 = vld [vmem:[#allocation9 + $0x180] ss:$12 sps:$4 sm:$0xff]  }
 0x542   : > { %4643 = vrcp.f32 %v5171_v3  ;;  %v4585_v3 = vld [vmem:[#allocation9 + $0x168] ss:$12 sps:$4 sm:$0xff]  }
 0x543   : > { %3320 = vmatpush1.bf16.msra.mxu0 %v4585_v3  ;;  %4645 = vrcp.f32 %v5173_v10  ;;  %v2877_v3 = vld [vmem:[%s5261_s3] sm:$0x7] }
 0x549   : > { %v4638_v22 = vpop.eup %4637 }
 0x54a   : > { %v2166_v24 = vmul.f32 %v4638_v22, %v5130_v8  ;;  %v4558_v8 = vld [vmem:[#allocation9 + $0xe0] ss:$12 sps:$4 sm:$0xff]   ;;  %v4640_v44 = vpop.eup %4639  ;;  %v4594_v22 = vld [vmem:[#allocation9 + $0x184] ss:$12 sps:$4 sm:$0xff]  }
 0x54b   : > { %3958 = vmatprep.subr.bf16.mxu1 %v4558_v8  ;;  %v4642_v56 = vpop.eup %4641  ;;  %3330 = vmatprep.subr.bf16.mxu0 %v4594_v22 }
 0x54c   : > { %v2167_v48 = vpack.c.bf16 %v2166_v24, %v2166_v24  ;;  %3959 = vmatpush3.bf16.msra.mxu1 %v4559_v26  ;;  %v4644_v12 = vpop.eup %4643  ;;  %v2595_v26 = vsel %vm2107_vm4, %v5162_v59, 0.0  ;;  %v4596_v59 = vld [vmem:[#allocation9 + $0x198] ss:$12 sps:$4 sm:$0xff]  }
 0x54d   : > { %3960 = vmatprep.subr.bf16.mxu1 %v4563_v35  ;;  %v4646_v27 = vpop.eup %4645 }
 0x54e   : > { %2169 = vst.msk [vmem:[#allocation3] sm:$0xf] %vm2168_vm5, %v2167_v48 }
 0x550   : > { %3961 = vmatpush3.bf16.msra.mxu1 %v4564_v39  ;;  %v4595_v39 = vld [vmem:[#allocation9 + $0x188] ss:$12 sps:$4 sm:$0xff]  }
 0x551   : > { %3962 = vmatprep.subr.bf16.mxu1 %v4568_v41  ;;  %v4599_v41 = vld [vmem:[#allocation9 + $0x1a0] ss:$12 sps:$4 sm:$0xff]  }
 0x554   : > { %3963 = vmatpush3.bf16.msra.mxu1 %v4569_v43  ;;  %v4600_v43 = vld [vmem:[#allocation9 + $0x1b0] ss:$12 sps:$4 sm:$0xff]  }
 0x555   : > { %3964 = vmatprep.subr.bf16.mxu1 %v4573_v5  ;;  %v4607_v5 = vld [vmem:[#allocation9 + $0x1d0] ss:$12 sps:$4 sm:$0xff]  }
 0x558   : > { %3965 = vmatpush3.bf16.msra.mxu1 %v4574_v54  ;;  %v4616_v54 = vld [vmem:[#allocation9 + $0x210] ss:$12 sps:$4 sm:$0xff]  }
 0x559   : > { %3966 = vmatprep.subr.bf16.mxu1 %v4578_v58  ;;  %v4623_v58 = vld [vmem:[#allocation9 + $0x230] ss:$12 sps:$4 sm:$0xff]  }
 0x55c   : > { %3967 = vmatpush3.bf16.msra.mxu1 %v4579_v60 }
 0x55d   : > { %3968 = vmatprep.subr.bf16.mxu1 %v4583_v1 }
 0x560   : > { %3969 = vmatpush3.bf16.msra.mxu1 %v4584_v6 }
 0x561   : > { %3970 = vmatprep.subr.bf16.mxu1 %v4588_v9  ;;  %v2881_v9 = vsub.s32 0, %v5088_v21 }
 0x564   : > { %3971 = vmatpush3.bf16.msra.mxu1 %v4589_v11  ;;  %v2885_v11 = vsub.s32 1, %v5088_v21 }
 0x565   : > { %4079 = vmatprep.subr.bf16.mxu1 %v4815_v16 }
 0x579   : > { %v2285_v45 = vpop.f32.mrb[24].mxu1 }
 0x57a   : > { %v2291_v38 = vmul.f32 %v4640_v44, %v2285_v45  ;;  %v4029_v47 = vpop.f32.mrb[25].mxu1  ;;  %v4603_v44 = vld [vmem:[#allocation9 + $0x1b8] ss:$12 sps:$4 sm:$0xff]  }
 0x57b   : > { %v2288_v51 = vpop.f32.mrb[26].mxu1  ;;  %v4606_v45 = vld [vmem:[#allocation9 + $0x1cc] ss:$12 sps:$4 sm:$0xff]   ;;  %v4611_v47 = vld [vmem:[#allocation9 + $0x1e8] ss:$12 sps:$4 sm:$0xff]  }
 0x57c   : > { %v3898_v52 = vpack.c.bf16 %v2291_v38, %v2291_v38  ;;  %v4030_v53 = vpop.f32.mrb[27].mxu1  ;;  %v4610_v38 = vld [vmem:[#allocation9 + $0x1e4] ss:$12 sps:$4 sm:$0xff]  }
 0x57d   : > { %v4612_v51 = vld [vmem:[#allocation9 + $0x1f8] ss:$12 sps:$4 sm:$0xff]   ;;  %v4618_v53 = vld [vmem:[#allocation9 + $0x214] ss:$12 sps:$4 sm:$0xff]  }
 0x57e   : > { %2296 = vrot.lane.b32.xlu0 %v3898_v52, %s4817_s21  ;;  %v4615_v52 = vld [vmem:[#allocation9 + $0x200] ss:$12 sps:$4 sm:$0xff]  }
 0x581   : > { %v2401_v57 = vpop.f32.mrb[28].mxu1 }
 0x582   : > { %v2407_v50 = vmul.f32 %v4642_v56, %v2401_v57  ;;  %v4041_v61 = vpop.f32.mrb[29].mxu1  ;;  %v4622_v56 = vld [vmem:[#allocation9 + $0x22c] ss:$12 sps:$4 sm:$0xff]   ;;  %v4620_v57 = vld [vmem:[#allocation9 + $0x228] ss:$12 sps:$4 sm:$0xff]  }
 0x583   : > { %v2404_v0 = vpop.f32.mrb[30].mxu1 }
 0x584   : > { %v2408_v2 = vpack.c.bf16 %v2407_v50, %v2407_v50  ;;  %v4042_v4 = vpop.f32.mrb[31].mxu1 }
 0x586   : > { %2409 = vst.msk [vmem:[#allocation3 + $0x4] sm:$0xf] %vm2168_vm5, %v2408_v2 }
 0x589   : > { %v2525_v14 = vpop.f32.mrb[32].mxu1 }
 0x58a   : > { %v2531_v15 = vmul.f32 %v4644_v12, %v2525_v14  ;;  %v4053_v17 = vpop.f32.mrb[33].mxu1  ;;  %v2890_v12 = vrot.slane %v2877_v3, %v2889_v7  ;;  %v2882_v14 = vrot.slane %v2877_v3, %v2881_v9 }
 0x58b   : > { %v2528_v18 = vpop.f32.mrb[34].mxu1 }
 0x58c   : > { %v3899_v19 = vpack.c.bf16 %v2531_v15, %v2531_v15  ;;  %v4054_v20 = vpop.f32.mrb[35].mxu1  ;;  %v2886_v15 = vrot.slane %v2877_v3, %v2885_v11 }
 0x58e   : > { %2536 = vrot.lane.b32.xlu1 %v3899_v19, %s4817_s21 }
 0x591   : > { %v5183_v23 = vpop.f32.mrb[36].mxu1 }
 0x592   : > { %v4065_v24 = vpop.f32.mrb[37].mxu1 }
 0x593   : > { %v2643_v25 = vpop.f32.mrb[38].mxu1 }
 0x594   : > { %v4066_v48 = vpop.f32.mrb[39].mxu1 }
 0x599   : > { %v2764_v28 = vpop.f32.mrb[40].mxu1 }
 0x59a   : > { %v2770_v29 = vmul.f32 %v4646_v27, %v2764_v28  ;;  %v4077_v30 = vpop.f32.mrb[41].mxu1 }
 0x59b   : > { %v2767_v31 = vpop.f32.mrb[42].mxu1 }
 0x59c   : > { %v3900_v32 = vpack.c.bf16 %v2770_v29, %v2770_v29  ;;  %v4078_v8 = vpop.f32.mrb[43].mxu1 }
 0x59e   : > { %2775 = vrot.lane.b32.xlu0 %v3900_v32, %s4817_s21 }
 0x5b2   : > { %2596 = vadd.xlane.f32.xlu1 %v2595_v26 }
 0x5f0   : > { %v2297_v10 = vpop.permute.xlu0 %2296 }
 0x5f1   : > { %2300 = vst.msk [vmem:[#allocation3] sm:$0xf] %vm2299_vm6, %v2297_v10 }
 0x600   : > { %v2537_v33 = vpop.permute.xlu1 %2536 }
 0x601   : > { %2539 = vst.msk [vmem:[#allocation3 + $0x4] sm:$0xf] %vm2299_vm6, %v2537_v33 }
 0x608   : > { %v2779_v34 = vld [vmem:[#allocation3] sm:$0xff] }
 0x609   : > { %v3815_v35 = vcombine.low %v2779_v34, %v2779_v34  ;;  %v3816_v36 = vcombine.high %v2779_v34, %v2779_v34 }
 0x60b   : > { %3321 = vmatprep.mubr.bf16.mxu0 %v3816_v36  ;;  %3403 = vmatprep.mubr.bf16.mxu1 %v3816_v36 }
 0x60c   : > { %3322 = vmatmul.mubr.bf16.vlgmr.msra.gmra.mrb[28].mxu0 %v3815_v35  ;;  %3404 = vmatmul.mubr.bf16.vlgmr.msra.gmra.mrb[44].mxu1 %v3815_v35 }
 0x60d   : > { %3331 = vmatpush1.bf16.msra.mxu0 %v4592_v37  ;;  %4080 = vmatpush3.bf16.msra.mxu1 %v4595_v39 }
 0x60e   : > { %3332 = vmatprep.subr.bf16.mxu0 %v4598_v40  ;;  %4081 = vmatprep.subr.bf16.mxu1 %v4815_v16 }
 0x60f   : > { %3362 = vmatprep.mubr.bf16.mxu0 %v4814_v13  ;;  %4095 = vmatprep.mubr.msk.bf16.mxu1 %vm4816_vm0, %v4815_v16  ;;  %v4608_v13 = vld [vmem:[#allocation9 + $0x1e0] ss:$12 sps:$4 sm:$0xff]  }
 0x610   : > { %v2776_v63 = vpop.permute.xlu0 %2775 }
 0x611   : > { %3333 = vmatpush1.bf16.msra.mxu0 %v4596_v59  ;;  %4082 = vmatpush3.bf16.msra.mxu1 %v4599_v41 }
 0x612   : > { %3334 = vmatprep.subr.bf16.mxu0 %v4602_v42  ;;  %4083 = vmatprep.subr.bf16.mxu1 %v4815_v16 }
 0x615   : > { %3335 = vmatpush1.bf16.msra.mxu0 %v4600_v43  ;;  %4084 = vmatpush3.bf16.msra.mxu1 %v4603_v44 }
 0x616   : > { %3336 = vmatprep.subr.bf16.mxu0 %v4606_v45  ;;  %4085 = vmatprep.subr.bf16.mxu1 %v4815_v16 }
 0x619   : > { %3337 = vmatpush1.bf16.msra.mxu0 %v4604_v46  ;;  %4086 = vmatpush3.bf16.msra.mxu1 %v4607_v5 }
 0x61a   : > { %3338 = vmatprep.subr.bf16.mxu0 %v4610_v38  ;;  %4087 = vmatprep.subr.bf16.mxu1 %v4815_v16 }
 0x61d   : > { %3339 = vmatpush1.bf16.msra.mxu0 %v4608_v13  ;;  %4088 = vmatpush3.bf16.msra.mxu1 %v4611_v47 }
 0x61e   : > { %3340 = vmatprep.subr.bf16.mxu0 %v4614_v49  ;;  %4089 = vmatprep.subr.bf16.mxu1 %v4815_v16 }
 0x621   : > { %3341 = vmatpush1.bf16.msra.mxu0 %v4612_v51  ;;  %4090 = vmatpush3.bf16.msra.mxu1 %v4615_v52 }
 0x622   : > { %3342 = vmatprep.subr.bf16.mxu0 %v4618_v53  ;;  %4091 = vmatprep.subr.bf16.mxu1 %v4815_v16 }
 0x625   : > { %3343 = vmatpush1.bf16.msra.mxu0 %v4616_v54  ;;  %4092 = vmatpush3.bf16.msra.mxu1 %v4619_v55 }
 0x626   : > { %3344 = vmatprep.subr.bf16.mxu0 %v4622_v56  ;;  %4093 = vmatprep.subr.bf16.mxu1 %v4815_v16 }
 0x629   : > { %3345 = vmatpush1.bf16.msra.mxu0 %v4620_v57  ;;  %4094 = vmatpush3.bf16.msra.mxu1 %v4623_v58 }
 0x63f   : > { %v2597_v60 = vpop.xlane.xlu1 %2596 }
 0x640   : > { %4647 = vrcp.f32 %v2597_v60 }
 0x64a   : > { %v4648_v50 = vpop.eup %4647 }
 0x64b   : > { %v2646_v61 = vmul.f32 %v4648_v50, %v5183_v23 }
 0x64d   : > { %v2647_v62 = vpack.c.bf16 %v2646_v61, %v2646_v61 }
 0x64f   : > { %2648 = vst.msk [vmem:[#allocation3 + $0x8] sm:$0xf] %vm2168_vm5, %v2647_v62 }
 0x650   : > { %2778 = vst.msk [vmem:[#allocation3 + $0x8] sm:$0xf] %vm2299_vm6, %v2776_v63 }
 0x657   : > { %v4624_v0 = vld [vmem:[#allocation3 + $0x8] ss:$0 sps:$4 sm:$0xff]  }
 0x658   : > { %3363 = vmatmul.mubr.bf16.vlgmr.msra.gmra.mrb[28].mxu0 %v4624_v0  ;;  %4096 = vmatmul.mubr.bf16.vlgmr.msra.gmra.mrb[48].mxu1 %v4624_v0 }
 0x6df   : > { %v3972_v1 = vpop.f32.mrb[44].mxu1 }
 0x6e0   : > { %v3973_v16 = vpop.f32.mrb[45].mxu1 }
 0x6e1   : > { %v3974_v2 = vadd.f32 %v3973_v16, %v3972_v1  ;;  %v3975_v4 = vpop.f32.mrb[46].mxu1 }
 0x6e2   : > { %v3976_v6 = vpop.f32.mrb[47].mxu1 }
 0x6e3   : > { %v3406_v17 = vadd.f32 %v3974_v2, %v2890_v12 }
 0x72b   : > { %v3364_v18 = vpop.f32.mrb[28].mxu0  ;;  %v3445_v19 = vpop.f32.mrb[48].mxu1 }
 0x72c   : > { %v4099_v20 = vadd.f32 %v3364_v18, %v2882_v14  ;;  %v3446_v22 = vadd.f32 %v3445_v19, %v3406_v17  ;;  %v3366_v23 = vpop.f32.mrb[29].mxu0  ;;  %v4097_v24 = vpop.f32.mrb[49].mxu1 }
 0x72d   : > { %v4100_v25 = vadd.f32 %v3366_v23, %v2886_v15  ;;  %v3368_v48 = vpop.f32.mrb[30].mxu0  ;;  %v3448_v27 = vpop.f32.mrb[50].mxu1 }
 0x72e   : > { %3451 = vst [vmem:[%s242_s7] sm:$0xff] %v4099_v20  ;;  %3453 = vst [vmem:[%s242_s7 + $0x10] sm:$0xff] %v3446_v22  ;;  %v3369_v21 = vpop.f32.mrb[31].mxu0  ;;  %v4098_v28 = vpop.f32.mrb[51].mxu1 }
 0x72f   : > { %3452 = vst [vmem:[%s242_s7 + $0x8] sm:$0xff] %v4100_v25 }
 0x730   : > { %4748 = shalt.err (!%p4745_p2)
}
 0x731   : > { %s4749_s6 = scalar_lea.hbm %s5214_s26, 384  ;;  %s4753_s21 = scalar_lea.hbm %s5262_s4, 768 }
 0x732   : > { %p4750_p13 = scmp.ne.s32.totalorder %s5214_s26, %s4749_s6  ;;  %p4754_p4 = scmp.lt.u32.totalorder %s5214_s26, %s5262_s4 }
 0x733   : > { %p4755_p7 = scmp.lt.u32.totalorder %s4753_s21, %s4749_s6  ;;  %p4757_p11 = scmp.lt.u32.totalorder %s4749_s6, %s5214_s26 }
 0x734   : > { %p4751_p6 = pnand %p4750_p13, %p5276_p0 }
 0x735   : > { %p4756_p8 = por %p4755_p7, %p4754_p4 }
 0x736   : > { %p4752_p10 = pneg %p4751_p6 }
 0x737   : > { %p4758_p1 = por %p4757_p11, %p4756_p8 }
 0x739   : > { %p4759_p3 = pnand %p4758_p1, %p4752_p10 }
 0x73b   : > { %4762 = shalt.err (!%p4759_p3)
}
 0x73c   : > { %4136 = dma.vmem_to_hbm [thread:$0]  (%p5276_p0), %s5216_s12, 384, %s5214_s26, %s3455_s19  }
 0x73d PF: > { %s3481_s5 = sand.u32 1, %s4793_s15   ;;  %p5277_p5 = scmp.ne.s32.totalorder %s5267_s22, 0 }
 0x73e   : > { %p5278_p9 = scmp.ge.s32.totalorder %s4805_s18, 2  ;;  %s3482_s25 = scalar_lea.sflag [#allocation6], %s3481_s5 }
 0x740   : > { %p4150_p12 = pnand %p5278_p9, %p5277_p5 }
 0x742   : > { %4788 = dma.done.wait (!%p4150_p12), %s3482_s25, 384  }
 0x743   : > { %4790 = vsyncadd (!%p4150_p12), %s3482_s25, 4294966912  ;;  %p18_p2 = scmp.ge.s32.totalorder %s4955_s11, 4   ;;  %s5279_s15 = smov %s4797_s16 }
 0x744   : > { %s5280_s16 = smov %s4801_s17  ;;  %s5281_s17 = smov %s4964_s14 }
 0x745   : > { %s5282_s18 = smov %s4955_s11  ;;  %20 = sbr.rel (!%p18_p2) target bundleno = 6 (0x6), region = 89 }
 0x74c   :  { %3487 = vsyncpa [#allocation5], 1 }
 0x74d   :  { %3489 = vsyncpa [#allocation5 + $0x1], 1 }
 0x74e   :  { %3490 = vsyncpa [#allocation8], 1 }
 0x74f   :  { %3491 = vsyncpa [#allocation6], 1 }
 0x750   :  { %3493 = vsyncpa [#allocation6 + $0x1], 1 }

</bundles_post_ra>
